<compile_context>
chip_gen: v7x
topology: tpu7x:2x2x1
jax: 0.10.0
libtpu: 0.0.40
codegen_flags: <defaults>
</compile_context>

<pallas_src>
import functools
import math

import jax
import jax.numpy as jnp
from jax.experimental import pallas as pl
from jax.experimental.pallas import tpu as pltpu

LEAKY_SLOPE = 0.2
BN_EPS = 1e-5


def _round_up(x, m):
    return ((x + m - 1) // m) * m


@functools.lru_cache(maxsize=1)
def _tpu_budget():
    """(vmem_limit_bytes, tm_cap) — generation aware, conservative fallback."""
    phys = 64 * 1024 * 1024                       # safe default (v7x-sized)
    try:
        info = pltpu.get_tpu_info()
        phys = int(getattr(info, "vmem_capacity_bytes", phys))
    except Exception:
        pass
    limit = min(phys * 6 // 10, 96 * 1024 * 1024)
    limit = (limit // (1 << 20)) * (1 << 20)
    tm_cap = 512 if phys >= 96 * 1024 * 1024 else 256
    return limit, tm_cap


def _fit_tm(tm, K, Np, out_bytes, vmem_limit, emit_stats):
    """Shrink TM (multiples of 16) until the double-buffered block fits VMEM."""
    budget = int(vmem_limit * 0.7)
    fixed = 2 * (K * Np * 2) + 2 * (Np * 4)       # resident weight + bias
    if emit_stats:
        fixed += 2 * (8 * Np * 4)
    while tm > 16:
        per = 2 * tm * (K * 2 + Np * out_bytes)   # patches + output, x2 buffers
        if fixed + per <= budget:
            break
        tm = max(16, ((tm // 2) + 15) // 16 * 16)
    return tm


# ----------------------------------------------------------------------------
# Pallas kernel: one (TM, Np) output tile = full-K, full-N patch matmul
# ----------------------------------------------------------------------------
def _conv_kernel(p_ref, w_ref, b_ref, o_ref, *stats_refs,
                 apply_act, emit_stats, slope):
    """y = patches @ weights + bias  (+ optional LeakyReLU).

    grid = (M tiles,).  Weight/bias blocks have a constant index_map → DMA'd
    once.  f32 accumulation via preferred_element_type; output stored in
    o_ref.dtype (bf16 for intermediates).  When emit_stats, rows 0/1 of the
    (8, Np) stats block receive per-channel sum / sum-of-squares taken from the
    f32 accumulator (BatchNorm batch stats need no separate activation pass).
    """
    y = jnp.dot(p_ref[...], w_ref[...], preferred_element_type=jnp.float32)
    y = y + b_ref[...]                                  # (TM,Np) + (1,Np)
    if apply_act:
        y = jnp.where(y >= 0, y, slope * y)
    o_ref[...] = y.astype(o_ref.dtype)
    if emit_stats:
        stats_ref = stats_refs[0]
        stats_ref[0:1, :] = jnp.sum(y, axis=0, keepdims=True)
        stats_ref[1:2, :] = jnp.sum(y * y, axis=0, keepdims=True)


# ----------------------------------------------------------------------------
# JAX glue: im2col patch extraction (strided slicing / reshape only)
# ----------------------------------------------------------------------------
def _im2col(x, k, stride, pad):
    """x: (N, H, W, C) -> (N*Ho*Wo, k*k*C); K-order = (kh, kw, ci)."""
    N, H, W, C = x.shape
    xp = jnp.pad(x, ((0, 0), (pad, pad), (pad, pad), (0, 0)))
    Ho = (H + 2 * pad - k) // stride + 1
    Wo = (W + 2 * pad - k) // stride + 1
    cols = []
    for kh in range(k):
        for kw in range(k):
            cols.append(jax.lax.slice(
                xp,
                (0, kh, kw, 0),
                (N, kh + stride * (Ho - 1) + 1, kw + stride * (Wo - 1) + 1, C),
                (1, stride, stride, 1)))                # (N, Ho, Wo, C)
    patches = jnp.stack(cols, axis=3)                   # (N, Ho, Wo, k*k, C)
    return patches.reshape(N * Ho * Wo, k * k * C), Ho, Wo


# ----------------------------------------------------------------------------
# One Conv2d layer; previous layer's BN+LeakyReLU is fused into its input prep
# ----------------------------------------------------------------------------
def conv_bn_act_layer(x, w_hwio, b, *, stride, pad, use_bn, use_act,
                      pre_norm=None, out_dtype=jnp.bfloat16,
                      negative_slope=LEAKY_SLOPE, eps=BN_EPS):
    N, H, W, Cin = x.shape
    k = w_hwio.shape[0]
    Cout = w_hwio.shape[-1]
    assert w_hwio.shape[2] == Cin

    # ---- input prep: consumer-side BN-apply + LeakyReLU fusion ---------------
    # Normalisation runs on the raw pre-BN bf16 activation *before* the zero
    # spatial pad (exact PyTorch semantics) and is fused by XLA into the im2col
    # gather — no standalone BN pass over HBM.
    xf = x.astype(jnp.float32)
    if pre_norm is not None:
        mean_p, inv_p, slope_p = pre_norm
        xf = (xf - mean_p.reshape(1, 1, 1, -1)) * inv_p.reshape(1, 1, 1, -1)
        if slope_p is not None:
            xf = jnp.where(xf >= 0, xf, slope_p * xf)
    x16 = xf.astype(jnp.bfloat16)

    # Pad input channels with zeros so K = k*k*Cin_p is a multiple of 128 —
    # no K-padding pass over the big patch matrix is ever needed.
    cmul = 128 // math.gcd(128, k * k)
    Cin_p = _round_up(Cin, cmul)
    if Cin_p > Cin:
        x16 = jnp.pad(x16, ((0, 0), (0, 0), (0, 0), (0, Cin_p - Cin)))
        w_hwio = jnp.pad(w_hwio, ((0, 0), (0, 0), (0, Cin_p - Cin), (0, 0)))

    patches, Ho, Wo = _im2col(x16, k, stride, pad)      # (M, K) bf16
    M, K = patches.shape

    # ---- tiling: full-K, full-N, 1-D grid over M -----------------------------
    vmem_limit, tm_cap = _tpu_budget()
    out_bytes = jnp.dtype(out_dtype).itemsize
    Np = 128 if Cout <= 128 else _round_up(Cout, 256)   # >=256-wide MXU feeds

    Mp_a = _round_up(M, 16)
    TM = min(tm_cap, Mp_a)
    if TM == Mp_a and Mp_a >= 32 and Mp_a % 32 == 0:
        TM = Mp_a // 2                                  # >=2 tiles for megacore
    TM = _fit_tm(TM, K, Np, out_bytes, vmem_limit, use_bn)
    Mp = _round_up(Mp_a, TM)
    mt = Mp // TM

    if Mp > M:       # only a ragged handful of rows; padded rows stay exactly 0
        patches = jnp.pad(patches, ((0, Mp - M), (0, 0)))
    wmat = w_hwio.reshape(K, Cout).astype(jnp.bfloat16)
    bmat = b.astype(jnp.float32).reshape(1, Cout)
    if Np > Cout:
        wmat = jnp.pad(wmat, ((0, 0), (0, Np - Cout)))
        bmat = jnp.pad(bmat, ((0, 0), (0, Np - Cout)))

    in_specs = [
        pl.BlockSpec((TM, K), lambda i: (i, 0)),        # patch stream
        pl.BlockSpec((K, Np), lambda i: (0, 0)),        # weight: resident, DMA'd once
        pl.BlockSpec((1, Np), lambda i: (0, 0)),        # bias: resident
    ]
    if use_bn:
        out_shape = (jax.ShapeDtypeStruct((Mp, Np), out_dtype),
                     jax.ShapeDtypeStruct((mt * 8, Np), jnp.float32))
        out_specs = (pl.BlockSpec((TM, Np), lambda i: (i, 0)),
                     pl.BlockSpec((8, Np), lambda i: (i, 0)))
    else:
        out_shape = jax.ShapeDtypeStruct((Mp, Np), out_dtype)
        out_specs = pl.BlockSpec((TM, Np), lambda i: (i, 0))

    res = pl.pallas_call(
        functools.partial(_conv_kernel,
                          apply_act=(use_act and not use_bn),
                          emit_stats=use_bn,
                          slope=negative_slope),
        grid=(mt,),
        in_specs=in_specs,
        out_specs=out_specs,
        out_shape=out_shape,
        compiler_params=pltpu.CompilerParams(
            dimension_semantics=("parallel",),
            vmem_limit_bytes=vmem_limit),
    )(patches, wmat, bmat)

    if not use_bn:
        return res[:M, :Cout].reshape(N, Ho, Wo, Cout)

    y_mat, stats = res
    # Tiny cross-tile reduction of the per-tile partial sums (JAX glue).
    st = stats.reshape(mt, 8, Np)
    ssum = jnp.sum(st[:, 0, :Cout], axis=0)
    ssq = jnp.sum(st[:, 1, :Cout], axis=0)
    cnt = jnp.float32(M)                    # padded rows contribute exactly 0
    mean = ssum / cnt
    var = jnp.maximum(ssq / cnt - mean * mean, 0.0)     # biased, PyTorch BN fwd
    inv = jax.lax.rsqrt(var + eps)
    y = y_mat[:M, :Cout].reshape(N, Ho, Wo, Cout)       # raw pre-BN y (bf16)
    return y, mean, inv


# ----------------------------------------------------------------------------
# Discriminator definition (mirrors the PyTorch module)
# ----------------------------------------------------------------------------
def build_config(nc, ndf, n_layers=3):
    cfg = [dict(cin=nc, cout=ndf, stride=2, bias=True, bn=False, act=True)]
    ndf_mult = 1
    for n in range(1, n_layers):
        prev = ndf_mult
        ndf_mult = min(2 ** n, 8)
        cfg.append(dict(cin=ndf * prev, cout=ndf * ndf_mult, stride=2,
                        bias=False, bn=True, act=True))
    prev = ndf_mult
    ndf_mult = min(2 ** n_layers, 8)
    cfg.append(dict(cin=ndf * prev, cout=ndf * ndf_mult, stride=1,
                    bias=False, bn=True, act=True))
    cfg.append(dict(cin=ndf * ndf_mult, cout=1, stride=1,
                    bias=True, bn=False, act=False))
    return cfg


def init_params(key, cfg):
    params = {}
    for i, layer in enumerate(cfg):
        cin, cout = layer["cin"], layer["cout"]
        kw_key = jax.random.fold_in(key, 2 * i)
        kb_key = jax.random.fold_in(key, 2 * i + 1)
        # PyTorch layout (Cout, Cin, kh, kw) -> HWIO (kh, kw, Cin, Cout)
        w_oihw = 0.02 * jax.random.normal(kw_key, (cout, cin, 4, 4), jnp.float32)
        params[f"w{i}"] = jnp.transpose(w_oihw, (2, 3, 1, 0))
        if layer["bias"]:
            params[f"b{i}"] = 0.02 * jax.random.normal(kb_key, (cout,), jnp.float32)
        else:
            params[f"b{i}"] = jnp.zeros((cout,), jnp.float32)
        # BatchNorm2d default gamma=1 / beta=0 is folded into the fused BN apply.
    return params


def discriminator_forward(x_nchw, params, cfg):
    x = jnp.transpose(x_nchw, (0, 2, 3, 1))     # NCHW -> NHWC (channels on lanes)
    pending = None                               # (mean, inv, slope) to fuse next
    n_layers_total = len(cfg)
    for i, layer in enumerate(cfg):
        # BN batch-stat shortcut relies on bias-free conv for BN layers.
        assert not (layer["bn"] and layer["bias"]), "BN layer must be bias-free"
        last = (i == n_layers_total - 1)
        res = conv_bn_act_layer(
            x, params[f"w{i}"], params[f"b{i}"],
            stride=layer["stride"], pad=1,
            use_bn=layer["bn"], use_act=layer["act"],
            pre_norm=pending,
            out_dtype=jnp.float32 if last else jnp.bfloat16)
        if layer["bn"]:
            x, mean, inv = res
            pending = (mean, inv, LEAKY_SLOPE if layer["act"] else None)
        else:
            x, pending = res, None
    assert pending is None                       # final layer is never BN
    return jnp.transpose(x, (0, 3, 1, 2))        # NHWC -> NCHW


# ----------------------------------------------------------------------------
# Pure-JAX reference (dtype knobs let it mirror the kernel's precision exactly)
# ----------------------------------------------------------------------------
def reference_forward(x_nchw, params, cfg, *, matmul_dtype=jnp.float32,
                      store_dtype=jnp.float32):
    x = jnp.transpose(x_nchw, (0, 2, 3, 1)).astype(store_dtype)
    pending = None
    n_layers_total = len(cfg)
    for i, layer in enumerate(cfg):
        xin = x.astype(jnp.float32)
        if pending is not None:
            mean, inv, slope = pending
            xin = (xin - mean) * inv
            if slope is not None:
                xin = jnp.where(xin >= 0, xin, slope * xin)
            pending = None
        s = layer["stride"]
        y = jax.lax.conv_general_dilated(
            xin.astype(matmul_dtype), params[f"w{i}"].astype(matmul_dtype),
            (s, s), ((1, 1), (1, 1)),
            dimension_numbers=("NHWC", "HWIO", "NHWC"),
            preferred_element_type=jnp.float32)
        y = y + params[f"b{i}"].reshape(1, 1, 1, -1)
        if layer["bn"]:
            mean = jnp.mean(y, axis=(0, 1, 2))
            var = jnp.maximum(jnp.mean(y * y, axis=(0, 1, 2)) - mean * mean, 0.0)
            inv = jax.lax.rsqrt(var + BN_EPS)
            pending = (mean.reshape(1, 1, 1, -1), inv.reshape(1, 1, 1, -1),
                       LEAKY_SLOPE if layer["act"] else None)
            x = y.astype(store_dtype)
        else:
            if layer["act"]:
                y = jnp.where(y >= 0, y, LEAKY_SLOPE * y)
            x = y.astype(store_dtype if i < n_layers_total - 1 else jnp.float32)
    return jnp.transpose(x.astype(jnp.float32), (0, 3, 1, 2))


# ----------------------------------------------------------------------------
if __name__ == "__main__":
    key = jax.random.PRNGKey(0)

    nc, ndf, n_layers = 3, 8, 3
    N, H, W = 2, 32, 32   # spatial >= 32 so all five 4x4 convs produce valid output

    cfg = build_config(nc, ndf, n_layers)
    params = init_params(key, cfg)
    x = jax.random.normal(jax.random.fold_in(key, 999), (N, nc, H, W), jnp.float32)

    fwd = jax.jit(functools.partial(discriminator_forward, cfg=cfg))
    out = jax.block_until_ready(fwd(x, params))

    # Tight check vs a reference with matched precision (bf16 matmul operands,
    # bf16 intermediate storage, f32 accumulate / BN stats); loose check vs the
    # f32 PyTorch-faithful reference.
    ref_match = reference_forward(x, params, cfg,
                                  matmul_dtype=jnp.bfloat16,
                                  store_dtype=jnp.bfloat16)
    ref_f32 = reference_forward(x, params, cfg)

    assert out.shape == ref_f32.shape == (N, 1, 2, 2), (out.shape, ref_f32.shape)
    assert bool(jnp.allclose(out, ref_match, atol=2e-2, rtol=2e-2)), \
        "mismatch vs matched-precision reference"
    assert bool(jnp.allclose(out, ref_f32, atol=1e-1, rtol=1e-1)), \
        "mismatch vs f32 reference"

    print("KERNEL_OK")
</pallas_src>

<mosaic_0001>
module attributes {stable_mosaic.version = 11 : i64} {
  func.func @_conv_kernel(%arg0: i32, %arg1: memref<256x128xbf16, #tpu.memory_space<vmem>>, %arg2: memref<128x128xbf16, #tpu.memory_space<vmem>>, %arg3: memref<1x128xf32, #tpu.memory_space<vmem>>, %arg4: memref<256x128xbf16, #tpu.memory_space<vmem>>) attributes {dimension_semantics = [#tpu.dimension_semantics<parallel>], iteration_bounds = array<i64: 2>, scalar_prefetch = 0 : i64, scratch_operands = 0 : i64, tpu.core_type = #tpu.core_type<tc>, window_params = [{transform_indices = @transform_0, window_bounds = array<i64: 256, 128>}, {pipeline_mode = #tpu.pipeline_mode<synchronous>, transform_indices = @transform_1, window_bounds = array<i64: 128, 128>}, {pipeline_mode = #tpu.pipeline_mode<synchronous>, transform_indices = @transform_2, window_bounds = array<i64: 1, 128>}, {transform_indices = @transform_3, window_bounds = array<i64: 256, 128>}]} {
    %c0 = arith.constant 0 : index
    %c0_0 = arith.constant 0 : index
    %0 = vector.load %arg1[%c0, %c0_0] : memref<256x128xbf16, #tpu.memory_space<vmem>>, vector<256x128xbf16>
    %c0_1 = arith.constant 0 : index
    %c0_2 = arith.constant 0 : index
    %1 = vector.load %arg2[%c0_1, %c0_2] : memref<128x128xbf16, #tpu.memory_space<vmem>>, vector<128x128xbf16>
    %cst = arith.constant dense<0.000000e+00> : vector<256x128xf32>
    %2 = tpu.matmul %0, %1, %cst {dimension_numbers = #tpu.dot_dimension_numbers<[1], [0], [0], [1], [0, 0, 1, 1], [], []>} : vector<256x128xbf16>, vector<128x128xbf16>, vector<256x128xf32> -> vector<256x128xf32>
    %c0_3 = arith.constant 0 : index
    %c0_4 = arith.constant 0 : index
    %3 = vector.load %arg3[%c0_3, %c0_4] : memref<1x128xf32, #tpu.memory_space<vmem>>, vector<1x128xf32>
    %4 = vector.broadcast %3 : vector<1x128xf32> to vector<256x128xf32>
    %5 = arith.addf %2, %4 : vector<256x128xf32>
    %cst_5 = arith.constant 0.000000e+00 : f32
    %6 = vector.broadcast %cst_5 : f32 to vector<256x128xf32>
    %7 = arith.cmpf oge, %5, %6 : vector<256x128xf32>
    %cst_6 = arith.constant 2.000000e-01 : f32
    %8 = vector.broadcast %cst_6 : f32 to vector<256x128xf32>
    %9 = arith.mulf %8, %5 : vector<256x128xf32>
    %10 = arith.select %7, %5, %9 : vector<256x128xi1>, vector<256x128xf32>
    %11 = arith.truncf %10 : vector<256x128xf32> to vector<256x128xbf16>
    %c0_7 = arith.constant 0 : index
    %c0_8 = arith.constant 0 : index
    %12 = vector.load %arg4[%c0_7, %c0_8] : memref<256x128xbf16, #tpu.memory_space<vmem>>, vector<256x128xbf16>
    tpu.vector_store %arg4[%c0_7, %c0_8], %11 {strides = array<i32>} : memref<256x128xbf16, #tpu.memory_space<vmem>>, vector<256x128xbf16>,
    return
  }
  func.func @transform_0(%arg0: i32) -> (i32, i32) {
    %c0_i32 = arith.constant 0 : i32
    %c0_i32_0 = arith.constant 0 : i32
    return %arg0, %c0_i32 : i32, i32
  }
  func.func @transform_1(%arg0: i32) -> (i32, i32) {
    %c0_i32 = arith.constant 0 : i32
    %c0_i32_0 = arith.constant 0 : i32
    %c0_i32_1 = arith.constant 0 : i32
    return %c0_i32, %c0_i32_0 : i32, i32
  }
  func.func @transform_2(%arg0: i32) -> (i32, i32) {
    %c0_i32 = arith.constant 0 : i32
    %c0_i32_0 = arith.constant 0 : i32
    %c0_i32_1 = arith.constant 0 : i32
    return %c0_i32, %c0_i32_0 : i32, i32
  }
  func.func @transform_3(%arg0: i32) -> (i32, i32) {
    %c0_i32 = arith.constant 0 : i32
    %c0_i32_0 = arith.constant 0 : i32
    return %arg0, %c0_i32 : i32, i32
  }
}

module attributes {stable_mosaic.version = 11 : i64} {
  func.func @_conv_kernel(%arg0: i32, %arg1: memref<64x128xbf16, #tpu.memory_space<vmem>>, %arg2: memref<128x128xbf16, #tpu.memory_space<vmem>>, %arg3: memref<1x128xf32, #tpu.memory_space<vmem>>, %arg4: memref<64x128xbf16, #tpu.memory_space<vmem>>, %arg5: memref<8x128xf32, #tpu.memory_space<vmem>>) attributes {dimension_semantics = [#tpu.dimension_semantics<parallel>], iteration_bounds = array<i64: 2>, scalar_prefetch = 0 : i64, scratch_operands = 0 : i64, tpu.core_type = #tpu.core_type<tc>, window_params = [{transform_indices = @transform_0, window_bounds = array<i64: 64, 128>}, {pipeline_mode = #tpu.pipeline_mode<synchronous>, transform_indices = @transform_1, window_bounds = array<i64: 128, 128>}, {pipeline_mode = #tpu.pipeline_mode<synchronous>, transform_indices = @transform_2, window_bounds = array<i64: 1, 128>}, {transform_indices = @transform_3, window_bounds = array<i64: 64, 128>}, {transform_indices = @transform_4, window_bounds = array<i64: 8, 128>}]} {
    %c0 = arith.constant 0 : index
    %c0_0 = arith.constant 0 : index
    %0 = vector.load %arg1[%c0, %c0_0] : memref<64x128xbf16, #tpu.memory_space<vmem>>, vector<64x128xbf16>
    %c0_1 = arith.constant 0 : index
    %c0_2 = arith.constant 0 : index
    %1 = vector.load %arg2[%c0_1, %c0_2] : memref<128x128xbf16, #tpu.memory_space<vmem>>, vector<128x128xbf16>
    %cst = arith.constant dense<0.000000e+00> : vector<64x128xf32>
    %2 = tpu.matmul %0, %1, %cst {dimension_numbers = #tpu.dot_dimension_numbers<[1], [0], [0], [1], [0, 0, 1, 1], [], []>} : vector<64x128xbf16>, vector<128x128xbf16>, vector<64x128xf32> -> vector<64x128xf32>
    %c0_3 = arith.constant 0 : index
    %c0_4 = arith.constant 0 : index
    %3 = vector.load %arg3[%c0_3, %c0_4] : memref<1x128xf32, #tpu.memory_space<vmem>>, vector<1x128xf32>
    %4 = vector.broadcast %3 : vector<1x128xf32> to vector<64x128xf32>
    %5 = arith.addf %2, %4 : vector<64x128xf32>
    %6 = arith.truncf %5 : vector<64x128xf32> to vector<64x128xbf16>
    %c0_5 = arith.constant 0 : index
    %c0_6 = arith.constant 0 : index
    %7 = vector.load %arg4[%c0_5, %c0_6] : memref<64x128xbf16, #tpu.memory_space<vmem>>, vector<64x128xbf16>
    tpu.vector_store %arg4[%c0_5, %c0_6], %6 {strides = array<i32>} : memref<64x128xbf16, #tpu.memory_space<vmem>>, vector<64x128xbf16>,
    %cst_7 = arith.constant dense<0.000000e+00> : vector<128xf32>
    %8 = vector.multi_reduction <add>, %5, %cst_7 [0] : vector<64x128xf32> to vector<128xf32>
    %9 = vector.shape_cast %8 : vector<128xf32> to vector<1x128xf32>
    %c0_8 = arith.constant 0 : index
    %c0_9 = arith.constant 0 : index
    %10 = vector.load %arg5[%c0_8, %c0_9] : memref<8x128xf32, #tpu.memory_space<vmem>>, vector<1x128xf32>
    tpu.vector_store %arg5[%c0_8, %c0_9], %9 {strides = array<i32>} : memref<8x128xf32, #tpu.memory_space<vmem>>, vector<1x128xf32>,
    %11 = arith.mulf %5, %5 : vector<64x128xf32>
    %cst_10 = arith.constant dense<0.000000e+00> : vector<128xf32>
    %12 = vector.multi_reduction <add>, %11, %cst_10 [0] : vector<64x128xf32> to vector<128xf32>
    %13 = vector.shape_cast %12 : vector<128xf32> to vector<1x128xf32>
    %c1 = arith.constant 1 : index
    %c0_11 = arith.constant 0 : index
    %14 = vector.load %arg5[%c1, %c0_11] : memref<8x128xf32, #tpu.memory_space<vmem>>, vector<1x128xf32>
    tpu.vector_store %arg5[%c1, %c0_11], %13 {strides = array<i32>} : memref<8x128xf32, #tpu.memory_space<vmem>>, vector<1x128xf32>,
    return
  }
  func.func @transform_0(%arg0: i32) -> (i32, i32) {
    %c0_i32 = arith.constant 0 : i32
    %c0_i32_0 = arith.constant 0 : i32
    return %arg0, %c0_i32 : i32, i32
  }
  func.func @transform_1(%arg0: i32) -> (i32, i32) {
    %c0_i32 = arith.constant 0 : i32
    %c0_i32_0 = arith.constant 0 : i32
    %c0_i32_1 = arith.constant 0 : i32
    return %c0_i32, %c0_i32_0 : i32, i32
  }
  func.func @transform_2(%arg0: i32) -> (i32, i32) {
    %c0_i32 = arith.constant 0 : i32
    %c0_i32_0 = arith.constant 0 : i32
    %c0_i32_1 = arith.constant 0 : i32
    return %c0_i32, %c0_i32_0 : i32, i32
  }
  func.func @transform_3(%arg0: i32) -> (i32, i32) {
    %c0_i32 = arith.constant 0 : i32
    %c0_i32_0 = arith.constant 0 : i32
    return %arg0, %c0_i32 : i32, i32
  }
  func.func @transform_4(%arg0: i32) -> (i32, i32) {
    %c0_i32 = arith.constant 0 : i32
    %c0_i32_0 = arith.constant 0 : i32
    return %arg0, %c0_i32 : i32, i32
  }
}

module attributes {stable_mosaic.version = 11 : i64} {
  func.func @_conv_kernel(%arg0: i32, %arg1: memref<16x256xbf16, #tpu.memory_space<vmem>>, %arg2: memref<256x128xbf16, #tpu.memory_space<vmem>>, %arg3: memref<1x128xf32, #tpu.memory_space<vmem>>, %arg4: memref<16x128xbf16, #tpu.memory_space<vmem>>, %arg5: memref<8x128xf32, #tpu.memory_space<vmem>>) attributes {dimension_semantics = [#tpu.dimension_semantics<parallel>], iteration_bounds = array<i64: 2>, scalar_prefetch = 0 : i64, scratch_operands = 0 : i64, tpu.core_type = #tpu.core_type<tc>, window_params = [{transform_indices = @transform_0, window_bounds = array<i64: 16, 256>}, {pipeline_mode = #tpu.pipeline_mode<synchronous>, transform_indices = @transform_1, window_bounds = array<i64: 256, 128>}, {pipeline_mode = #tpu.pipeline_mode<synchronous>, transform_indices = @transform_2, window_bounds = array<i64: 1, 128>}, {transform_indices = @transform_3, window_bounds = array<i64: 16, 128>}, {transform_indices = @transform_4, window_bounds = array<i64: 8, 128>}]} {
    %c0 = arith.constant 0 : index
    %c0_0 = arith.constant 0 : index
    %0 = vector.load %arg1[%c0, %c0_0] : memref<16x256xbf16, #tpu.memory_space<vmem>>, vector<16x256xbf16>
    %c0_1 = arith.constant 0 : index
    %c0_2 = arith.constant 0 : index
    %1 = vector.load %arg2[%c0_1, %c0_2] : memref<256x128xbf16, #tpu.memory_space<vmem>>, vector<256x128xbf16>
    %cst = arith.constant dense<0.000000e+00> : vector<16x128xf32>
    %2 = tpu.matmul %0, %1, %cst {dimension_numbers = #tpu.dot_dimension_numbers<[1], [0], [0], [1], [0, 0, 1, 1], [], []>} : vector<16x256xbf16>, vector<256x128xbf16>, vector<16x128xf32> -> vector<16x128xf32>
    %c0_3 = arith.constant 0 : index
    %c0_4 = arith.constant 0 : index
    %3 = vector.load %arg3[%c0_3, %c0_4] : memref<1x128xf32, #tpu.memory_space<vmem>>, vector<1x128xf32>
    %4 = vector.broadcast %3 : vector<1x128xf32> to vector<16x128xf32>
    %5 = arith.addf %2, %4 : vector<16x128xf32>
    %6 = arith.truncf %5 : vector<16x128xf32> to vector<16x128xbf16>
    %c0_5 = arith.constant 0 : index
    %c0_6 = arith.constant 0 : index
    %7 = vector.load %arg4[%c0_5, %c0_6] : memref<16x128xbf16, #tpu.memory_space<vmem>>, vector<16x128xbf16>
    tpu.vector_store %arg4[%c0_5, %c0_6], %6 {strides = array<i32>} : memref<16x128xbf16, #tpu.memory_space<vmem>>, vector<16x128xbf16>,
    %cst_7 = arith.constant dense<0.000000e+00> : vector<128xf32>
    %8 = vector.multi_reduction <add>, %5, %cst_7 [0] : vector<16x128xf32> to vector<128xf32>
    %9 = vector.shape_cast %8 : vector<128xf32> to vector<1x128xf32>
    %c0_8 = arith.constant 0 : index
    %c0_9 = arith.constant 0 : index
    %10 = vector.load %arg5[%c0_8, %c0_9] : memref<8x128xf32, #tpu.memory_space<vmem>>, vector<1x128xf32>
    tpu.vector_store %arg5[%c0_8, %c0_9], %9 {strides = array<i32>} : memref<8x128xf32, #tpu.memory_space<vmem>>, vector<1x128xf32>,
    %11 = arith.mulf %5, %5 : vector<16x128xf32>
    %cst_10 = arith.constant dense<0.000000e+00> : vector<128xf32>
    %12 = vector.multi_reduction <add>, %11, %cst_10 [0] : vector<16x128xf32> to vector<128xf32>
    %13 = vector.shape_cast %12 : vector<128xf32> to vector<1x128xf32>
    %c1 = arith.constant 1 : index
    %c0_11 = arith.constant 0 : index
    %14 = vector.load %arg5[%c1, %c0_11] : memref<8x128xf32, #tpu.memory_space<vmem>>, vector<1x128xf32>
    tpu.vector_store %arg5[%c1, %c0_11], %13 {strides = array<i32>} : memref<8x128xf32, #tpu.memory_space<vmem>>, vector<1x128xf32>,
    return
  }
  func.func @transform_0(%arg0: i32) -> (i32, i32) {
    %c0_i32 = arith.constant 0 : i32
    %c0_i32_0 = arith.constant 0 : i32
    return %arg0, %c0_i32 : i32, i32
  }
  func.func @transform_1(%arg0: i32) -> (i32, i32) {
    %c0_i32 = arith.constant 0 : i32
    %c0_i32_0 = arith.constant 0 : i32
    %c0_i32_1 = arith.constant 0 : i32
    return %c0_i32, %c0_i32_0 : i32, i32
  }
  func.func @transform_2(%arg0: i32) -> (i32, i32) {
    %c0_i32 = arith.constant 0 : i32
    %c0_i32_0 = arith.constant 0 : i32
    %c0_i32_1 = arith.constant 0 : i32
    return %c0_i32, %c0_i32_0 : i32, i32
  }
  func.func @transform_3(%arg0: i32) -> (i32, i32) {
    %c0_i32 = arith.constant 0 : i32
    %c0_i32_0 = arith.constant 0 : i32
    return %arg0, %c0_i32 : i32, i32
  }
  func.func @transform_4(%arg0: i32) -> (i32, i32) {
    %c0_i32 = arith.constant 0 : i32
    %c0_i32_0 = arith.constant 0 : i32
    return %arg0, %c0_i32 : i32, i32
  }
}

module attributes {stable_mosaic.version = 11 : i64} {
  func.func @_conv_kernel(%arg0: i32, %arg1: memref<16x512xbf16, #tpu.memory_space<vmem>>, %arg2: memref<512x128xbf16, #tpu.memory_space<vmem>>, %arg3: memref<1x128xf32, #tpu.memory_space<vmem>>, %arg4: memref<16x128xbf16, #tpu.memory_space<vmem>>, %arg5: memref<8x128xf32, #tpu.memory_space<vmem>>) attributes {dimension_semantics = [#tpu.dimension_semantics<parallel>], iteration_bounds = array<i64: 2>, scalar_prefetch = 0 : i64, scratch_operands = 0 : i64, tpu.core_type = #tpu.core_type<tc>, window_params = [{transform_indices = @transform_0, window_bounds = array<i64: 16, 512>}, {pipeline_mode = #tpu.pipeline_mode<synchronous>, transform_indices = @transform_1, window_bounds = array<i64: 512, 128>}, {pipeline_mode = #tpu.pipeline_mode<synchronous>, transform_indices = @transform_2, window_bounds = array<i64: 1, 128>}, {transform_indices = @transform_3, window_bounds = array<i64: 16, 128>}, {transform_indices = @transform_4, window_bounds = array<i64: 8, 128>}]} {
    %c0 = arith.constant 0 : index
    %c0_0 = arith.constant 0 : index
    %0 = vector.load %arg1[%c0, %c0_0] : memref<16x512xbf16, #tpu.memory_space<vmem>>, vector<16x512xbf16>
    %c0_1 = arith.constant 0 : index
    %c0_2 = arith.constant 0 : index
    %1 = vector.load %arg2[%c0_1, %c0_2] : memref<512x128xbf16, #tpu.memory_space<vmem>>, vector<512x128xbf16>
    %cst = arith.constant dense<0.000000e+00> : vector<16x128xf32>
    %2 = tpu.matmul %0, %1, %cst {dimension_numbers = #tpu.dot_dimension_numbers<[1], [0], [0], [1], [0, 0, 1, 1], [], []>} : vector<16x512xbf16>, vector<512x128xbf16>, vector<16x128xf32> -> vector<16x128xf32>
    %c0_3 = arith.constant 0 : index
    %c0_4 = arith.constant 0 : index
    %3 = vector.load %arg3[%c0_3, %c0_4] : memref<1x128xf32, #tpu.memory_space<vmem>>, vector<1x128xf32>
    %4 = vector.broadcast %3 : vector<1x128xf32> to vector<16x128xf32>
    %5 = arith.addf %2, %4 : vector<16x128xf32>
    %6 = arith.truncf %5 : vector<16x128xf32> to vector<16x128xbf16>
    %c0_5 = arith.constant 0 : index
    %c0_6 = arith.constant 0 : index
    %7 = vector.load %arg4[%c0_5, %c0_6] : memref<16x128xbf16, #tpu.memory_space<vmem>>, vector<16x128xbf16>
    tpu.vector_store %arg4[%c0_5, %c0_6], %6 {strides = array<i32>} : memref<16x128xbf16, #tpu.memory_space<vmem>>, vector<16x128xbf16>,
    %cst_7 = arith.constant dense<0.000000e+00> : vector<128xf32>
    %8 = vector.multi_reduction <add>, %5, %cst_7 [0] : vector<16x128xf32> to vector<128xf32>
    %9 = vector.shape_cast %8 : vector<128xf32> to vector<1x128xf32>
    %c0_8 = arith.constant 0 : index
    %c0_9 = arith.constant 0 : index
    %10 = vector.load %arg5[%c0_8, %c0_9] : memref<8x128xf32, #tpu.memory_space<vmem>>, vector<1x128xf32>
    tpu.vector_store %arg5[%c0_8, %c0_9], %9 {strides = array<i32>} : memref<8x128xf32, #tpu.memory_space<vmem>>, vector<1x128xf32>,
    %11 = arith.mulf %5, %5 : vector<16x128xf32>
    %cst_10 = arith.constant dense<0.000000e+00> : vector<128xf32>
    %12 = vector.multi_reduction <add>, %11, %cst_10 [0] : vector<16x128xf32> to vector<128xf32>
    %13 = vector.shape_cast %12 : vector<128xf32> to vector<1x128xf32>
    %c1 = arith.constant 1 : index
    %c0_11 = arith.constant 0 : index
    %14 = vector.load %arg5[%c1, %c0_11] : memref<8x128xf32, #tpu.memory_space<vmem>>, vector<1x128xf32>
    tpu.vector_store %arg5[%c1, %c0_11], %13 {strides = array<i32>} : memref<8x128xf32, #tpu.memory_space<vmem>>, vector<1x128xf32>,
    return
  }
  func.func @transform_0(%arg0: i32) -> (i32, i32) {
    %c0_i32 = arith.constant 0 : i32
    %c0_i32_0 = arith.constant 0 : i32
    return %arg0, %c0_i32 : i32, i32
  }
  func.func @transform_1(%arg0: i32) -> (i32, i32) {
    %c0_i32 = arith.constant 0 : i32
    %c0_i32_0 = arith.constant 0 : i32
    %c0_i32_1 = arith.constant 0 : i32
    return %c0_i32, %c0_i32_0 : i32, i32
  }
  func.func @transform_2(%arg0: i32) -> (i32, i32) {
    %c0_i32 = arith.constant 0 : i32
    %c0_i32_0 = arith.constant 0 : i32
    %c0_i32_1 = arith.constant 0 : i32
    return %c0_i32, %c0_i32_0 : i32, i32
  }
  func.func @transform_3(%arg0: i32) -> (i32, i32) {
    %c0_i32 = arith.constant 0 : i32
    %c0_i32_0 = arith.constant 0 : i32
    return %arg0, %c0_i32 : i32, i32
  }
  func.func @transform_4(%arg0: i32) -> (i32, i32) {
    %c0_i32 = arith.constant 0 : i32
    %c0_i32_0 = arith.constant 0 : i32
    return %arg0, %c0_i32 : i32, i32
  }
}

module attributes {stable_mosaic.version = 11 : i64} {
  func.func @_conv_kernel(%arg0: i32, %arg1: memref<16x1024xbf16, #tpu.memory_space<vmem>>, %arg2: memref<1024x128xbf16, #tpu.memory_space<vmem>>, %arg3: memref<1x128xf32, #tpu.memory_space<vmem>>, %arg4: memref<16x128xf32, #tpu.memory_space<vmem>>) attributes {dimension_semantics = [#tpu.dimension_semantics<parallel>], iteration_bounds = array<i64: 1>, scalar_prefetch = 0 : i64, scratch_operands = 0 : i64, tpu.core_type = #tpu.core_type<tc>, window_params = [{transform_indices = @transform_0, window_bounds = array<i64: 16, 1024>}, {pipeline_mode = #tpu.pipeline_mode<synchronous>, transform_indices = @transform_1, window_bounds = array<i64: 1024, 128>}, {pipeline_mode = #tpu.pipeline_mode<synchronous>, transform_indices = @transform_2, window_bounds = array<i64: 1, 128>}, {transform_indices = @transform_3, window_bounds = array<i64: 16, 128>}]} {
    %c0 = arith.constant 0 : index
    %c0_0 = arith.constant 0 : index
    %0 = vector.load %arg1[%c0, %c0_0] : memref<16x1024xbf16, #tpu.memory_space<vmem>>, vector<16x1024xbf16>
    %c0_1 = arith.constant 0 : index
    %c0_2 = arith.constant 0 : index
    %1 = vector.load %arg2[%c0_1, %c0_2] : memref<1024x128xbf16, #tpu.memory_space<vmem>>, vector<1024x128xbf16>
    %cst = arith.constant dense<0.000000e+00> : vector<16x128xf32>
    %2 = tpu.matmul %0, %1, %cst {dimension_numbers = #tpu.dot_dimension_numbers<[1], [0], [0], [1], [0, 0, 1, 1], [], []>} : vector<16x1024xbf16>, vector<1024x128xbf16>, vector<16x128xf32> -> vector<16x128xf32>
    %c0_3 = arith.constant 0 : index
    %c0_4 = arith.constant 0 : index
    %3 = vector.load %arg3[%c0_3, %c0_4] : memref<1x128xf32, #tpu.memory_space<vmem>>, vector<1x128xf32>
    %4 = vector.broadcast %3 : vector<1x128xf32> to vector<16x128xf32>
    %5 = arith.addf %2, %4 : vector<16x128xf32>
    %c0_5 = arith.constant 0 : index
    %c0_6 = arith.constant 0 : index
    %6 = vector.load %arg4[%c0_5, %c0_6] : memref<16x128xf32, #tpu.memory_space<vmem>>, vector<16x128xf32>
    tpu.vector_store %arg4[%c0_5, %c0_6], %5 {strides = array<i32>} : memref<16x128xf32, #tpu.memory_space<vmem>>, vector<16x128xf32>,
    return
  }
  func.func @transform_0(%arg0: i32) -> (i32, i32) {
    %c0_i32 = arith.constant 0 : i32
    %c0_i32_0 = arith.constant 0 : i32
    return %arg0, %c0_i32 : i32, i32
  }
  func.func @transform_1(%arg0: i32) -> (i32, i32) {
    %c0_i32 = arith.constant 0 : i32
    %c0_i32_0 = arith.constant 0 : i32
    %c0_i32_1 = arith.constant 0 : i32
    return %c0_i32, %c0_i32_0 : i32, i32
  }
  func.func @transform_2(%arg0: i32) -> (i32, i32) {
    %c0_i32 = arith.constant 0 : i32
    %c0_i32_0 = arith.constant 0 : i32
    %c0_i32_1 = arith.constant 0 : i32
    return %c0_i32, %c0_i32_0 : i32, i32
  }
  func.func @transform_3(%arg0: i32) -> (i32, i32) {
    %c0_i32 = arith.constant 0 : i32
    %c0_i32_0 = arith.constant 0 : i32
    return %arg0, %c0_i32 : i32, i32
  }
}

</mosaic_0001>

<bundles_post_ra>
// kernel: discriminator_forward.5
= control target key start
LH: loop header
LB: loop body
LE: loop exit
PB: predicated region body
PF: predicated region fallthrough
CT: control target
= control target key end

     0   :  { %s1190_s12 = smov 0   ;;  %s1317_s0 = inlined_call_operand.vmem [shape: bf16[512,128], index: 0, kind: input, shape index: {}]   ;;  %s1318_s1 = inlined_call_operand.vmem [shape: bf16[128,128], index: 1, kind: input, shape index: {}]   ;;  %s1319_s2 = inlined_call_operand.vmem [shape: f32[1,128], index: 2, kind: input, shape index: {}]   ;;  %s1320_s3 = inlined_call_operand.vmem [shape: bf16[512,128], index: 3, kind: output, shape index: {}]  }
   0x1 LB: > { %s847_s13 = sadd.s32 4294967295, %s1168_s12   ;;  %p851_p0 = scmp.ge.s32.totalorder %s1168_s12, 1  ;;  %s1168_s12 = sphi %s1190_s12, %s13_s12  }
   0x2   : > { %p138_p1 = scmp.lt.s32.totalorder %s1168_s12, 3 }
   0x4   : > { %p139_p2 = pnand %p851_p0, %p138_p1 }
   0x5   : > { %v1138_v0 = vld [vmem:[%s1318_s1] sm:$0xff] (!%p139_p2)   ;;  %s852_s16 = sshll.u32 (!%p139_p2), %s847_s13, 5  ;;  %v1139_v1 = vld [vmem:[%s1318_s1 + $0x8] sm:$0xff] (!%p139_p2)   ;;  %v1140_v2 = vld [vmem:[%s1318_s1 + $0x10] sm:$0xff] (!%p139_p2)  }
   0x6   : > { %142 = sbr.rel (%p139_p2) target bundleno = 293 (0x125), region = 32  ;;  %p163_p3 = scmp.lt.s32.totalorder (!%p139_p2), %s852_s16, 63  ;;  %1066 = vmatprep.subr.bf16.mxu0 (!%p139_p2), %v1138_v0  ;;  %1114 = vmatprep.subr.bf16.mxu1 (!%p139_p2), %v1138_v0  ;;  %v1141_v3 = vld [vmem:[%s1318_s1 + $0x18] sm:$0xff] (!%p139_p2)   ;;  %v1142_v6 = vld [vmem:[%s1318_s1 + $0x20] sm:$0xff] (!%p139_p2)   ;;  %v1143_v7 = vld [vmem:[%s1318_s1 + $0x28] sm:$0xff] (!%p139_p2)  }
   0x7   : > { %1067 = vmatpush3.bf16.msra.mxu0 (!%p139_p2), %v1138_v0  ;;  %1122 = vmatpush3.bf16.msra.mxu1 (!%p139_p2), %v1138_v0  ;;  %v1144_v8 = vld [vmem:[%s1318_s1 + $0x30] sm:$0xff] (!%p139_p2)   ;;  %v1145_v9 = vld [vmem:[%s1318_s1 + $0x38] sm:$0xff] (!%p139_p2)   ;;  %v1251_v24 = vld [vmem:[%s1319_s2] ss:$0 sm:$0xff] (!%p139_p2) }
   0x8   : > { %1068 = vmatprep.subr.bf16.mxu0 (!%p139_p2), %v1139_v1  ;;  %1115 = vmatprep.subr.bf16.mxu1 (!%p139_p2), %v1139_v1 }
   0xb   : > { %1069 = vmatpush3.bf16.msra.mxu0 (!%p139_p2), %v1139_v1  ;;  %1123 = vmatpush3.bf16.msra.mxu1 (!%p139_p2), %v1139_v1 }
   0xc   : > { %1070 = vmatprep.subr.bf16.mxu0 (!%p139_p2), %v1140_v2  ;;  %1116 = vmatprep.subr.bf16.mxu1 (!%p139_p2), %v1140_v2 }
   0xd   : > { %s1322_s16 = smov (!%p163_p3, %s852_s16), 63 }
   0xe   : > { %s853_s21 = sshll.u32 %s1322_s16, 2 }
   0xf   : > { %s1215_s24 = scalar_lea.vmem %s1317_s0, %s853_s21  ;;  %1071 = vmatpush3.bf16.msra.mxu0 %v1140_v2  ;;  %1124 = vmatpush3.bf16.msra.mxu1 %v1140_v2  ;;  %s1268_s13 = scalar_lea.vmem %s1320_s3, %s853_s21 }
  0x10   : > { %v1146_v4 = vld [vmem:[%s1215_s24] sm:$0xff]   ;;  %1072 = vmatprep.subr.bf16.mxu0 %v1141_v3  ;;  %1117 = vmatprep.subr.bf16.mxu1 %v1141_v3  ;;  %v1148_v10 = vld [vmem:[%s1215_s24 + $0x8] sm:$0xff]   ;;  %v1150_v12 = vld [vmem:[%s1215_s24 + $0x10] sm:$0xff]  }
  0x11   : > { %v1147_v5 = vld [vmem:[%s1215_s24 + $0x40] sm:$0xff]   ;;  %1082 = vmatprep.mubr.bf16.mxu0 %v1146_v4  ;;  %v1149_v11 = vld [vmem:[%s1215_s24 + $0x48] sm:$0xff]   ;;  %v1151_v13 = vld [vmem:[%s1215_s24 + $0x50] sm:$0xff]  }
  0x12   : > { %1098 = vmatprep.mubr.bf16.mxu1 %v1147_v5  ;;  %v1152_v14 = vld [vmem:[%s1215_s24 + $0x18] sm:$0xff]   ;;  %v1154_v16 = vld [vmem:[%s1215_s24 + $0x20] sm:$0xff]   ;;  %v1156_v18 = vld [vmem:[%s1215_s24 + $0x28] sm:$0xff]  }
  0x13   : > { %1073 = vmatpush3.bf16.msra.mxu0 %v1141_v3  ;;  %1125 = vmatpush3.bf16.msra.mxu1 %v1141_v3  ;;  %v1153_v15 = vld [vmem:[%s1215_s24 + $0x58] sm:$0xff]   ;;  %v1155_v17 = vld [vmem:[%s1215_s24 + $0x60] sm:$0xff]   ;;  %v1157_v19 = vld [vmem:[%s1215_s24 + $0x68] sm:$0xff]  }
  0x14   : > { %1074 = vmatprep.subr.bf16.mxu0 %v1142_v6  ;;  %1118 = vmatprep.subr.bf16.mxu1 %v1142_v6  ;;  %v1158_v20 = vld [vmem:[%s1215_s24 + $0x30] sm:$0xff]   ;;  %v1160_v22 = vld [vmem:[%s1215_s24 + $0x38] sm:$0xff]  }
  0x15   : > { %v1159_v21 = vld [vmem:[%s1215_s24 + $0x70] sm:$0xff]   ;;  %v1161_v23 = vld [vmem:[%s1215_s24 + $0x78] sm:$0xff]  }
  0x17   : > { %1075 = vmatpush3.bf16.msra.mxu0 %v1142_v6  ;;  %1126 = vmatpush3.bf16.msra.mxu1 %v1142_v6 }
  0x18   : > { %1076 = vmatprep.subr.bf16.mxu0 %v1143_v7  ;;  %1119 = vmatprep.subr.bf16.mxu1 %v1143_v7 }
  0x1b   : > { %1077 = vmatpush3.bf16.msra.mxu0 %v1143_v7  ;;  %1127 = vmatpush3.bf16.msra.mxu1 %v1143_v7 }
  0x1c   : > { %1078 = vmatprep.subr.bf16.mxu0 %v1144_v8  ;;  %1120 = vmatprep.subr.bf16.mxu1 %v1144_v8 }
  0x1f   : > { %1079 = vmatpush3.bf16.msra.mxu0 %v1144_v8  ;;  %1128 = vmatpush3.bf16.msra.mxu1 %v1144_v8 }
  0x20   : > { %1080 = vmatprep.subr.bf16.mxu0 %v1145_v9  ;;  %1121 = vmatprep.subr.bf16.mxu1 %v1145_v9 }
  0x23   : > { %1081 = vmatpush3.bf16.msra.mxu0 %v1145_v9  ;;  %1129 = vmatpush3.bf16.msra.mxu1 %v1145_v9 }
  0x26   : > { %1083 = vmatmul.mubr.bf16.vlgmr.msra.gmra.mrb[0].mxu0 %v1148_v10  ;;  %1099 = vmatmul.mubr.bf16.vlgmr.msra.gmra.mrb[0].mxu1 %v1149_v11 }
  0x27   : > { %1086 = vmatprep.mubr.bf16.mxu0 %v1150_v12  ;;  %1102 = vmatprep.mubr.bf16.mxu1 %v1151_v13 }
  0x2e   : > { %1087 = vmatmul.mubr.bf16.gmra.mrb[4].mxu0 %v1152_v14  ;;  %1103 = vmatmul.mubr.bf16.gmra.mrb[4].mxu1 %v1153_v15 }
  0x2f   : > { %1090 = vmatprep.mubr.bf16.mxu0 %v1154_v16  ;;  %1106 = vmatprep.mubr.bf16.mxu1 %v1155_v17 }
  0x36   : > { %1091 = vmatmul.mubr.bf16.gmra.mrb[8].mxu0 %v1156_v18  ;;  %1107 = vmatmul.mubr.bf16.gmra.mrb[8].mxu1 %v1157_v19 }
  0x37   : > { %1094 = vmatprep.mubr.bf16.mxu0 %v1158_v20  ;;  %1110 = vmatprep.mubr.bf16.mxu1 %v1159_v21 }
  0x3e   : > { %1095 = vmatmul.mubr.bf16.gmra.mrb[12].mxu0 %v1160_v22  ;;  %1111 = vmatmul.mubr.bf16.gmra.mrb[12].mxu1 %v1161_v23 }
  0xf9   : > { %v1084_v25 = vpop.f32.mrb[0].mxu0  ;;  %v1100_v26 = vpop.f32.mrb[0].mxu1 }
  0xfa   : > { %v417_v27 = vadd.f32 %v1084_v25, %v1251_v24  ;;  %v481_v28 = vadd.f32 %v1100_v26, %v1251_v24  ;;  %v408_v29 = vpop.f32.mrb[1].mxu0  ;;  %v472_v30 = vpop.f32.mrb[1].mxu1 }
  0xfb   : > { %v409_v31 = vadd.f32 %v1251_v24, %v408_v29  ;;  %v473_v32 = vadd.f32 %v1251_v24, %v472_v30  ;;  %v1085_v33 = vpop.f32.mrb[2].mxu0  ;;  %v1101_v34 = vpop.f32.mrb[2].mxu1 }
  0xfc   : > { %vm537_vm0 = vcmp.ge.f32.partialorder %v417_v27, 0.0  ;;  %v569_v35 = vmul.f32 0.2, %v417_v27  ;;  %vm553_vm1 = vcmp.ge.f32.partialorder %v481_v28, 0.0  ;;  %v585_v36 = vmul.f32 0.2, %v481_v28 }
  0xfd   : > { %vm535_vm2 = vcmp.ge.f32.partialorder %v409_v31, 0.0  ;;  %v567_v37 = vmul.f32 0.2, %v409_v31  ;;  %vm551_vm3 = vcmp.ge.f32.partialorder %v473_v32, 0.0  ;;  %v583_v38 = vmul.f32 0.2, %v473_v32 }
  0xfe   : > { %v420_v39 = vadd.f32 %v1085_v33, %v1251_v24  ;;  %v484_v40 = vadd.f32 %v1101_v34, %v1251_v24  ;;  %v411_v41 = vpop.f32.mrb[3].mxu0  ;;  %v475_v42 = vpop.f32.mrb[3].mxu1  ;;  %v601_v43 = vsel %vm537_vm0, %v417_v27, %v569_v35  ;;  %v617_v44 = vsel %vm553_vm1, %v481_v28, %v585_v36 }
  0xff   : > { %v412_v45 = vadd.f32 %v1251_v24, %v411_v41  ;;  %v476_v46 = vadd.f32 %v1251_v24, %v475_v42  ;;  %v599_v51 = vsel %vm535_vm2, %v409_v31, %v567_v37  ;;  %v615_v52 = vsel %vm551_vm3, %v473_v32, %v583_v38 }
 0x100   : > { %vm538_vm4 = vcmp.ge.f32.partialorder %v420_v39, 0.0  ;;  %v570_v47 = vmul.f32 0.2, %v420_v39  ;;  %vm554_vm5 = vcmp.ge.f32.partialorder %v484_v40, 0.0  ;;  %v586_v48 = vmul.f32 0.2, %v484_v40 }
 0x101   : > { %vm536_vm6 = vcmp.ge.f32.partialorder %v412_v45, 0.0  ;;  %v568_v49 = vmul.f32 0.2, %v412_v45  ;;  %vm552_vm7 = vcmp.ge.f32.partialorder %v476_v46, 0.0  ;;  %v584_v50 = vmul.f32 0.2, %v476_v46 }
 0x102   : > { %v602_v53 = vsel %vm538_vm4, %v420_v39, %v570_v47  ;;  %v618_v54 = vsel %vm554_vm5, %v484_v40, %v586_v48  ;;  %v1088_v55 = vpop.f32.mrb[4].mxu0  ;;  %v1104_v56 = vpop.f32.mrb[4].mxu1 }
 0x103   : > { %v955_v57 = vpack.c.bf16 %v602_v53, %v601_v43  ;;  %v995_v58 = vpack.c.bf16 %v618_v54, %v617_v44  ;;  %v600_v59 = vsel %vm536_vm6, %v412_v45, %v568_v49  ;;  %v616_v60 = vsel %vm552_vm7, %v476_v46, %v584_v50  ;;  %v424_v61 = vpop.f32.mrb[5].mxu0  ;;  %v488_v62 = vpop.f32.mrb[5].mxu1 }
 0x104   : > { %v950_v63 = vpack.c.bf16 %v600_v59, %v599_v51  ;;  %v990_v0 = vpack.c.bf16 %v616_v60, %v615_v52  ;;  %v433_v1 = vadd.f32 %v1088_v55, %v1251_v24  ;;  %v497_v2 = vadd.f32 %v1104_v56, %v1251_v24  ;;  %v1089_v3 = vpop.f32.mrb[6].mxu0  ;;  %v1105_v4 = vpop.f32.mrb[6].mxu1 }
 0x105   : > { %1027 = vst [vmem:[%s1268_s13 + $0x8] sm:$0xff] %v955_v57   ;;  %1035 = vst [vmem:[%s1268_s13 + $0x48] sm:$0xff] %v995_v58   ;;  %v425_v5 = vadd.f32 %v1251_v24, %v424_v61  ;;  %v489_v6 = vadd.f32 %v1251_v24, %v488_v62  ;;  %v436_v7 = vadd.f32 %v1089_v3, %v1251_v24  ;;  %v427_v9 = vpop.f32.mrb[7].mxu0  ;;  %v491_v10 = vpop.f32.mrb[7].mxu1 }
 0x106   : > { %v500_v8 = vadd.f32 %v1105_v4, %v1251_v24  ;;  %951 = vst [vmem:[%s1268_s13] sm:$0xff] %v950_v63   ;;  %1034 = vst [vmem:[%s1268_s13 + $0x40] sm:$0xff] %v990_v0   ;;  %vm541_vm8 = vcmp.ge.f32.partialorder %v433_v1, 0.0  ;;  %v573_v11 = vmul.f32 0.2, %v433_v1  ;;  %vm557_vm9 = vcmp.ge.f32.partialorder %v497_v2, 0.0 }
 0x107   : > { %v589_v12 = vmul.f32 0.2, %v497_v2  ;;  %vm539_vm10 = vcmp.ge.f32.partialorder %v425_v5, 0.0  ;;  %v571_v13 = vmul.f32 0.2, %v425_v5  ;;  %vm555_vm11 = vcmp.ge.f32.partialorder %v489_v6, 0.0 }
 0x108   : > { %v605_v14 = vsel %vm541_vm8, %v433_v1, %v573_v11  ;;  %v587_v15 = vmul.f32 0.2, %v489_v6  ;;  %vm542_vm12 = vcmp.ge.f32.partialorder %v436_v7, 0.0  ;;  %v574_v16 = vmul.f32 0.2, %v436_v7 }
 0x109   : > { %v621_v17 = vsel %vm557_vm9, %v497_v2, %v589_v12  ;;  %v603_v18 = vsel %vm539_vm10, %v425_v5, %v571_v13  ;;  %vm558_vm13 = vcmp.ge.f32.partialorder %v500_v8, 0.0  ;;  %v590_v19 = vmul.f32 0.2, %v500_v8  ;;  %v1092_v20 = vpop.f32.mrb[8].mxu0  ;;  %v1108_v21 = vpop.f32.mrb[8].mxu1 }
 0x10a   : > { %v606_v22 = vsel %vm542_vm12, %v436_v7, %v574_v16  ;;  %v428_v23 = vadd.f32 %v1251_v24, %v427_v9  ;;  %v492_v25 = vadd.f32 %v1251_v24, %v491_v10  ;;  %v449_v26 = vadd.f32 %v1092_v20, %v1251_v24  ;;  %v440_v27 = vpop.f32.mrb[9].mxu0  ;;  %v504_v28 = vpop.f32.mrb[9].mxu1 }
 0x10b   : > { %v965_v29 = vpack.c.bf16 %v606_v22, %v605_v14  ;;  %v622_v30 = vsel %vm558_vm13, %v500_v8, %v590_v19  ;;  %v513_v31 = vadd.f32 %v1108_v21, %v1251_v24  ;;  %v441_v32 = vadd.f32 %v1251_v24, %v440_v27  ;;  %v1093_v33 = vpop.f32.mrb[10].mxu0  ;;  %v1109_v34 = vpop.f32.mrb[10].mxu1 }
 0x10c   : > { %v1005_v35 = vpack.c.bf16 %v622_v30, %v621_v17  ;;  %vm540_vm14 = vcmp.ge.f32.partialorder %v428_v23, 0.0  ;;  %v572_v36 = vmul.f32 0.2, %v428_v23  ;;  %vm556_vm15 = vcmp.ge.f32.partialorder %v492_v25, 0.0  ;;  %v443_v37 = vpop.f32.mrb[11].mxu0  ;;  %v507_v38 = vpop.f32.mrb[11].mxu1 }
 0x10d   : > { %1029 = vst [vmem:[%s1268_s13 + $0x18] sm:$0xff] %v965_v29   ;;  %v588_v39 = vmul.f32 0.2, %v492_v25  ;;  %vm545_vm0 = vcmp.ge.f32.partialorder %v449_v26, 0.0  ;;  %v577_v40 = vmul.f32 0.2, %v449_v26  ;;  %v619_v41 = vsel %vm555_vm11, %v489_v6, %v587_v15 }
 0x10e   : > { %vm561_vm1 = vcmp.ge.f32.partialorder %v513_v31, 0.0  ;;  %1037 = vst [vmem:[%s1268_s13 + $0x58] sm:$0xff] %v1005_v35   ;;  %v604_v42 = vsel %vm540_vm14, %v428_v23, %v572_v36  ;;  %v593_v43 = vmul.f32 0.2, %v513_v31  ;;  %vm543_vm2 = vcmp.ge.f32.partialorder %v441_v32, 0.0 }
 0x10f   : > { %v960_v44 = vpack.c.bf16 %v604_v42, %v603_v18  ;;  %v620_v45 = vsel %vm556_vm15, %v492_v25, %v588_v39  ;;  %v575_v46 = vmul.f32 0.2, %v441_v32  ;;  %v505_v47 = vadd.f32 %v1251_v24, %v504_v28 }
 0x110   : > { %v1000_v48 = vpack.c.bf16 %v620_v45, %v619_v41  ;;  %v609_v49 = vsel %vm545_vm0, %v449_v26, %v577_v40  ;;  %v625_v50 = vsel %vm561_vm1, %v513_v31, %v593_v43  ;;  %v452_v51 = vadd.f32 %v1093_v33, %v1251_v24 }
 0x111   : > { %1028 = vst [vmem:[%s1268_s13 + $0x10] sm:$0xff] %v960_v44   ;;  %vm559_vm3 = vcmp.ge.f32.partialorder %v505_v47, 0.0  ;;  %v591_v52 = vmul.f32 0.2, %v505_v47  ;;  %v516_v53 = vadd.f32 %v1109_v34, %v1251_v24  ;;  %v444_v54 = vadd.f32 %v1251_v24, %v443_v37  ;;  %v1096_v55 = vpop.f32.mrb[12].mxu0  ;;  %v1112_v56 = vpop.f32.mrb[12].mxu1 }
 0x112   : > { %1036 = vst [vmem:[%s1268_s13 + $0x50] sm:$0xff] %v1000_v48   ;;  %vm546_vm4 = vcmp.ge.f32.partialorder %v452_v51, 0.0  ;;  %v578_v57 = vmul.f32 0.2, %v452_v51  ;;  %v508_v58 = vadd.f32 %v1251_v24, %v507_v38  ;;  %v465_v59 = vadd.f32 %v1096_v55, %v1251_v24  ;;  %v456_v60 = vpop.f32.mrb[13].mxu0  ;;  %v520_v61 = vpop.f32.mrb[13].mxu1 }
 0x113   : > { %v607_v62 = vsel %vm543_vm2, %v441_v32, %v575_v46  ;;  %vm562_vm5 = vcmp.ge.f32.partialorder %v516_v53, 0.0  ;;  %v594_v63 = vmul.f32 0.2, %v516_v53  ;;  %vm544_vm6 = vcmp.ge.f32.partialorder %v444_v54, 0.0  ;;  %v1097_v0 = vpop.f32.mrb[14].mxu0  ;;  %v1113_v1 = vpop.f32.mrb[14].mxu1 }
 0x114   : > { %v610_v2 = vsel %vm546_vm4, %v452_v51, %v578_v57  ;;  %v576_v3 = vmul.f32 0.2, %v444_v54  ;;  %vm560_vm7 = vcmp.ge.f32.partialorder %v508_v58, 0.0  ;;  %v592_v4 = vmul.f32 0.2, %v508_v58  ;;  %v459_v5 = vpop.f32.mrb[15].mxu0 }
 0x115   : > { %v623_v6 = vsel %vm559_vm3, %v505_v47, %v591_v52  ;;  %v975_v7 = vpack.c.bf16 %v610_v2, %v609_v49  ;;  %v626_v8 = vsel %vm562_vm5, %v516_v53, %v594_v63  ;;  %v581_v9 = vmul.f32 0.2, %v465_v59  ;;  %v523_v10 = vpop.f32.mrb[15].mxu1 }
 0x116   : > { %v1015_v11 = vpack.c.bf16 %v626_v8, %v625_v50  ;;  %v608_v12 = vsel %vm544_vm6, %v444_v54, %v576_v3  ;;  %v624_v13 = vsel %vm560_vm7, %v508_v58, %v592_v4  ;;  %v529_v14 = vadd.f32 %v1112_v56, %v1251_v24 }
 0x117   : > { %1031 = vst [vmem:[%s1268_s13 + $0x28] sm:$0xff] %v975_v7   ;;  %v970_v15 = vpack.c.bf16 %v608_v12, %v607_v62  ;;  %v1010_v16 = vpack.c.bf16 %v624_v13, %v623_v6  ;;  %vm549_vm8 = vcmp.ge.f32.partialorder %v465_v59, 0.0  ;;  %v457_v17 = vadd.f32 %v1251_v24, %v456_v60 }
 0x118   : > { %1039 = vst [vmem:[%s1268_s13 + $0x68] sm:$0xff] %v1015_v11   ;;  %vm565_vm9 = vcmp.ge.f32.partialorder %v529_v14, 0.0  ;;  %v597_v18 = vmul.f32 0.2, %v529_v14  ;;  %v521_v19 = vadd.f32 %v1251_v24, %v520_v61  ;;  %v468_v20 = vadd.f32 %v1097_v0, %v1251_v24 }
 0x119   : > { %1030 = vst [vmem:[%s1268_s13 + $0x20] sm:$0xff] %v970_v15   ;;  %1038 = vst [vmem:[%s1268_s13 + $0x60] sm:$0xff] %v1010_v16   ;;  %v579_v21 = vmul.f32 0.2, %v457_v17  ;;  %v532_v22 = vadd.f32 %v1113_v1, %v1251_v24  ;;  %v460_v23 = vadd.f32 %v1251_v24, %v459_v5  ;;  %v613_v25 = vsel %vm549_vm8, %v465_v59, %v581_v9 }
 0x11a   : > { %vm547_vm10 = vcmp.ge.f32.partialorder %v457_v17, 0.0  ;;  %vm550_vm11 = vcmp.ge.f32.partialorder %v468_v20, 0.0  ;;  %v629_v26 = vsel %vm565_vm9, %v529_v14, %v597_v18  ;;  %v582_v27 = vmul.f32 0.2, %v468_v20 }
 0x11b   : > { %vm566_vm12 = vcmp.ge.f32.partialorder %v532_v22, 0.0  ;;  %v598_v28 = vmul.f32 0.2, %v532_v22  ;;  %vm563_vm13 = vcmp.ge.f32.partialorder %v521_v19, 0.0  ;;  %vm548_vm14 = vcmp.ge.f32.partialorder %v460_v23, 0.0 }
 0x11c   : > { %v580_v29 = vmul.f32 0.2, %v460_v23  ;;  %v524_v30 = vadd.f32 %v1251_v24, %v523_v10  ;;  %v611_v31 = vsel %vm547_vm10, %v457_v17, %v579_v21  ;;  %v595_v32 = vmul.f32 0.2, %v521_v19 }
 0x11d   : > { %v614_v33 = vsel %vm550_vm11, %v468_v20, %v582_v27  ;;  %v630_v34 = vsel %vm566_vm12, %v532_v22, %v598_v28 }
 0x11e   : > { %v985_v35 = vpack.c.bf16 %v614_v33, %v613_v25  ;;  %v1025_v36 = vpack.c.bf16 %v630_v34, %v629_v26  ;;  %v612_v37 = vsel %vm548_vm14, %v460_v23, %v580_v29  ;;  %vm564_vm15 = vcmp.ge.f32.partialorder %v524_v30, 0.0 }
 0x11f   : > { %v980_v38 = vpack.c.bf16 %v612_v37, %v611_v31  ;;  %v596_v39 = vmul.f32 0.2, %v524_v30  ;;  %v627_v40 = vsel %vm563_vm13, %v521_v19, %v595_v32 }
 0x120   : > { %1033 = vst [vmem:[%s1268_s13 + $0x38] sm:$0xff] %v985_v35   ;;  %1041 = vst [vmem:[%s1268_s13 + $0x78] sm:$0xff] %v1025_v36  }
 0x121   : > { %1032 = vst [vmem:[%s1268_s13 + $0x30] sm:$0xff] %v980_v38   ;;  %v628_v41 = vsel %vm564_vm15, %v524_v30, %v596_v39 }
 0x122   : > { %v1020_v42 = vpack.c.bf16 %v628_v41, %v627_v40 }
 0x124   : > { %1040 = vst [vmem:[%s1268_s13 + $0x70] sm:$0xff] %v1020_v42  }
 0x125 PF: > { %s13_s12 = sadd.s32 1, %s1168_s12  }
 0x126   : > { %p10_p4 = scmp.ge.s32.totalorder %s13_s12, 4  }
 0x128   :  { %12 = sbr.rel (!%p10_p4) target bundleno = 1 (0x1), region = 62 }

// kernel: discriminator_forward.6
= control target key start
LH: loop header
LB: loop body
LE: loop exit
PB: predicated region body
PF: predicated region fallthrough
CT: control target
= control target key end

     0   :  { %s713_s15 = smov 0   ;;  %s778_s0 = inlined_call_operand.vmem [shape: bf16[128,128], index: 0, kind: input, shape index: {}]   ;;  %s779_s1 = inlined_call_operand.vmem [shape: bf16[128,128], index: 1, kind: input, shape index: {}]   ;;  %s780_s2 = inlined_call_operand.vmem [shape: f32[1,128], index: 2, kind: input, shape index: {}]   ;;  %s781_s3 = inlined_call_operand.vmem [shape: bf16[128,128], index: 3, kind: output, shape index: {0}]   ;;  %s782_s4 = inlined_call_operand.vmem [shape: f32[16,128], index: 4, kind: output, shape index: {1}]  }
   0x1 LB: > { %s719_s16 = sadd.s32 4294967295, %s686_s15   ;;  %p548_p0 = scmp.ge.s32.totalorder %s686_s15, 1  ;;  %s686_s15 = sphi %s713_s15, %s15_s15  }
   0x2   : > { %p166_p1 = scmp.lt.s32.totalorder %s686_s15, 3 }
   0x4   : > { %p167_p2 = pnand %p548_p0, %p166_p1 }
   0x5   : > { %v668_v0 = vld [vmem:[%s779_s1] sm:$0xff] (!%p167_p2)   ;;  %s549_s19 = sshll.u32 (!%p167_p2), %s719_s16, 3  ;;  %v669_v1 = vld [vmem:[%s779_s1 + $0x8] sm:$0xff] (!%p167_p2)   ;;  %v670_v2 = vld [vmem:[%s779_s1 + $0x10] sm:$0xff] (!%p167_p2)   ;;  %p208_p4 = scmp.lt.s32.totalorder (!%p167_p2), %s719_s16, 1 }
   0x6   : > { %170 = sbr.rel (%p167_p2) target bundleno = 284 (0x11c), region = 32  ;;  %p197_p3 = scmp.lt.s32.totalorder (!%p167_p2), %s549_s19, 15  ;;  %620 = vmatprep.subr.bf16.mxu0 (!%p167_p2), %v668_v0  ;;  %644 = vmatprep.subr.bf16.mxu1 (!%p167_p2), %v668_v0  ;;  %v671_v3 = vld [vmem:[%s779_s1 + $0x18] sm:$0xff] (!%p167_p2)   ;;  %v672_v6 = vld [vmem:[%s779_s1 + $0x20] sm:$0xff] (!%p167_p2)   ;;  %v673_v7 = vld [vmem:[%s779_s1 + $0x28] sm:$0xff] (!%p167_p2)  }
   0x7   : > { %621 = vmatpush3.bf16.msra.mxu0 (!%p167_p2), %v668_v0  ;;  %652 = vmatpush3.bf16.msra.mxu1 (!%p167_p2), %v668_v0  ;;  %v674_v8 = vld [vmem:[%s779_s1 + $0x30] sm:$0xff] (!%p167_p2)   ;;  %v675_v9 = vld [vmem:[%s779_s1 + $0x38] sm:$0xff] (!%p167_p2)   ;;  %v554_v12 = vld [vmem:[%s780_s2] ss:$0 sm:$0xff] (!%p167_p2) }
   0x8   : > { %622 = vmatprep.subr.bf16.mxu0 (!%p167_p2), %v669_v1  ;;  %645 = vmatprep.subr.bf16.mxu1 (!%p167_p2), %v669_v1 }
   0xb   : > { %623 = vmatpush3.bf16.msra.mxu0 (!%p167_p2), %v669_v1  ;;  %653 = vmatpush3.bf16.msra.mxu1 (!%p167_p2), %v669_v1 }
   0xc   : > { %624 = vmatprep.subr.bf16.mxu0 (!%p167_p2), %v670_v2  ;;  %646 = vmatprep.subr.bf16.mxu1 (!%p167_p2), %v670_v2 }
   0xd   : > { %s784_s19 = smov (!%p197_p3, %s549_s19), 15  ;;  %s786_s16 = smov (!%p208_p4, %s719_s16), 1 }
   0xe   : > { %s550_s24 = sshll.u32 %s784_s19, 2  ;;  %s553_s19 = sshll.u32 %s786_s16, 3 }
   0xf   : > { %s741_s27 = scalar_lea.vmem %s778_s0, %s550_s24  ;;  %625 = vmatpush3.bf16.msra.mxu0 %v670_v2  ;;  %654 = vmatpush3.bf16.msra.mxu1 %v670_v2  ;;  %s206_s18 = scalar_lea.vmem %s781_s3, %s550_s24 }
  0x10   : > { %v676_v4 = vld [vmem:[%s741_s27] sm:$0xff]   ;;  %v678_v5 = vld [vmem:[%s741_s27 + $0x10] sm:$0xff]   ;;  %626 = vmatprep.subr.bf16.mxu0 %v671_v3  ;;  %647 = vmatprep.subr.bf16.mxu1 %v671_v3  ;;  %v677_v10 = vld [vmem:[%s741_s27 + $0x8] sm:$0xff]   ;;  %s211_s22 = scalar_lea.vmem %s782_s4, %s553_s19 }
  0x11   : > { %636 = vmatprep.mubr.bf16.mxu0 %v676_v4  ;;  %640 = vmatprep.mubr.bf16.mxu1 %v678_v5  ;;  %v679_v11 = vld [vmem:[%s741_s27 + $0x18] sm:$0xff]  }
  0x13   : > { %627 = vmatpush3.bf16.msra.mxu0 %v671_v3  ;;  %655 = vmatpush3.bf16.msra.mxu1 %v671_v3 }
  0x14   : > { %628 = vmatprep.subr.bf16.mxu0 %v672_v6  ;;  %648 = vmatprep.subr.bf16.mxu1 %v672_v6 }
  0x17   : > { %629 = vmatpush3.bf16.msra.mxu0 %v672_v6  ;;  %656 = vmatpush3.bf16.msra.mxu1 %v672_v6 }
  0x18   : > { %630 = vmatprep.subr.bf16.mxu0 %v673_v7  ;;  %649 = vmatprep.subr.bf16.mxu1 %v673_v7 }
  0x1b   : > { %631 = vmatpush3.bf16.msra.mxu0 %v673_v7  ;;  %657 = vmatpush3.bf16.msra.mxu1 %v673_v7 }
  0x1c   : > { %632 = vmatprep.subr.bf16.mxu0 %v674_v8  ;;  %650 = vmatprep.subr.bf16.mxu1 %v674_v8 }
  0x1f   : > { %633 = vmatpush3.bf16.msra.mxu0 %v674_v8  ;;  %658 = vmatpush3.bf16.msra.mxu1 %v674_v8 }
  0x20   : > { %634 = vmatprep.subr.bf16.mxu0 %v675_v9  ;;  %651 = vmatprep.subr.bf16.mxu1 %v675_v9 }
  0x23   : > { %635 = vmatpush3.bf16.msra.mxu0 %v675_v9  ;;  %659 = vmatpush3.bf16.msra.mxu1 %v675_v9 }
  0x26   : > { %637 = vmatmul.mubr.bf16.vlgmr.msra.gmra.mrb[0].mxu0 %v677_v10  ;;  %641 = vmatmul.mubr.bf16.vlgmr.msra.gmra.mrb[0].mxu1 %v679_v11 }
  0xf9   : > { %v638_v13 = vpop.f32.mrb[0].mxu0  ;;  %v642_v14 = vpop.f32.mrb[0].mxu1 }
  0xfa   : > { %v350_v15 = vpop.f32.mrb[1].mxu0  ;;  %v375_v16 = vadd.f32 %v642_v14, %v554_v12  ;;  %v366_v17 = vpop.f32.mrb[1].mxu1  ;;  %v359_v22 = vadd.f32 %v638_v13, %v554_v12 }
  0xfb   : > { %v351_v18 = vadd.f32 %v554_v12, %v350_v15  ;;  %v639_v19 = vpop.f32.mrb[2].mxu0  ;;  %v367_v20 = vadd.f32 %v554_v12, %v366_v17  ;;  %v643_v21 = vpop.f32.mrb[2].mxu1 }
  0xfc   : > { %v362_v23 = vadd.f32 %v639_v19, %v554_v12  ;;  %v353_v24 = vpop.f32.mrb[3].mxu0  ;;  %v378_v25 = vadd.f32 %v643_v21, %v554_v12  ;;  %v369_v26 = vpop.f32.mrb[3].mxu1  ;;  %v437_v36 = vmul.f32 %v359_v22, %v359_v22  ;;  %v441_v48 = vmul.f32 %v375_v16, %v375_v16 }
  0xfd   : > { %v354_v27 = vadd.f32 %v554_v12, %v353_v24  ;;  %v370_v28 = vadd.f32 %v554_v12, %v369_v26  ;;  %v435_v29 = vmul.f32 %v351_v18, %v351_v18  ;;  %v439_v42 = vmul.f32 %v367_v20, %v367_v20 }
  0xfe   : > { %v593_v30 = vpack.c.bf16 %v362_v23, %v359_v22  ;;  %v603_v31 = vpack.c.bf16 %v378_v25, %v375_v16  ;;  %v438_v39 = vmul.f32 %v362_v23, %v362_v23  ;;  %v442_v51 = vmul.f32 %v378_v25, %v378_v25 }
  0xff   : > { %v588_v32 = vpack.c.bf16 %v354_v27, %v351_v18  ;;  %v421_v33 = vadd.f32 %v354_v27, %v351_v18  ;;  %v436_v34 = vmul.f32 %v354_v27, %v354_v27  ;;  %v598_v35 = vpack.c.bf16 %v370_v28, %v367_v20 }
 0x100   : > { %605 = vst [vmem:[%s206_s18 + $0x8] sm:$0xff] %v593_v30   ;;  %607 = vst [vmem:[%s206_s18 + $0x18] sm:$0xff] %v603_v31   ;;  %v440_v47 = vmul.f32 %v370_v28, %v370_v28 }
 0x101   : > { %589 = vst [vmem:[%s206_s18] sm:$0xff] %v588_v32   ;;  %v422_v37 = vadd.f32 %v421_v33, %v359_v22  ;;  %v443_v38 = vadd.f32 %v436_v34, %v435_v29  ;;  %606 = vst [vmem:[%s206_s18 + $0x10] sm:$0xff] %v598_v35  }
 0x103   : > { %v444_v40 = vadd.f32 %v443_v38, %v437_v36  ;;  %v423_v41 = vadd.f32 %v422_v37, %v362_v23 }
 0x105   : > { %v424_v43 = vadd.f32 %v423_v41, %v367_v20  ;;  %v445_v44 = vadd.f32 %v444_v40, %v438_v39 }
 0x107   : > { %v446_v45 = vadd.f32 %v445_v44, %v439_v42  ;;  %v425_v46 = vadd.f32 %v424_v43, %v370_v28 }
 0x109   : > { %v426_v49 = vadd.f32 %v425_v46, %v375_v16  ;;  %v447_v50 = vadd.f32 %v446_v45, %v440_v47 }
 0x10b   : > { %v427_v52 = vadd.f32 %v426_v49, %v378_v25  ;;  %v448_v53 = vadd.f32 %v447_v50, %v441_v48 }
 0x10d   : > { %v428_v54 = vrot.slane %v427_v52, 4  ;;  %v449_v55 = vadd.f32 %v448_v53, %v442_v51 }
 0x10f   : > { %v429_v56 = vadd.f32 %v428_v54, %v427_v52  ;;  %v450_v57 = vrot.slane %v449_v55, 4 }
 0x111   : > { %v430_v58 = vrot.slane %v429_v56, 2  ;;  %v451_v59 = vadd.f32 %v450_v57, %v449_v55 }
 0x113   : > { %v431_v60 = vadd.f32 %v430_v58, %v429_v56  ;;  %v452_v61 = vrot.slane %v451_v59, 2 }
 0x115   : > { %v432_v62 = vrot.slane %v431_v60, 1  ;;  %v453_v63 = vadd.f32 %v452_v61, %v451_v59 }
 0x117   : > { %v433_v0 = vadd.f32 %v432_v62, %v431_v60  ;;  %v454_v1 = vrot.slane %v453_v63, 1 }
 0x119   : > { %434 = vst [vmem:[%s211_s22] sm:$0x1] %v433_v0  ;;  %v455_v2 = vadd.f32 %v454_v1, %v453_v63 }
 0x11b   : > { %456 = vst [vmem:[%s211_s22 + $0x1] sm:$0x1] %v455_v2 }
 0x11c PF: > { %s15_s15 = sadd.s32 1, %s686_s15  }
 0x11d   : > { %p12_p5 = scmp.ge.s32.totalorder %s15_s15, 4  }
 0x11f   :  { %14 = sbr.rel (!%p12_p5) target bundleno = 1 (0x1), region = 74 }

// kernel: discriminator_forward.7
= control target key start
LH: loop header
LB: loop body
LE: loop exit
PB: predicated region body
PF: predicated region fallthrough
CT: control target
= control target key end

     0   :  { %s643_s15 = smov 0   ;;  %s723_s0 = inlined_call_operand.vmem [shape: bf16[32,256], index: 0, kind: input, shape index: {}]   ;;  %s724_s1 = inlined_call_operand.vmem [shape: bf16[256,128], index: 1, kind: input, shape index: {}]   ;;  %s725_s2 = inlined_call_operand.vmem [shape: f32[1,128], index: 2, kind: input, shape index: {}]   ;;  %s726_s3 = inlined_call_operand.vmem [shape: bf16[32,128], index: 3, kind: output, shape index: {0}]   ;;  %s727_s4 = inlined_call_operand.vmem [shape: f32[16,128], index: 4, kind: output, shape index: {1}]  }
   0x1 LB: > { %s649_s16 = sadd.s32 4294967295, %s616_s15   ;;  %p523_p0 = scmp.ge.s32.totalorder %s616_s15, 1  ;;  %s616_s15 = sphi %s643_s15, %s15_s15  }
   0x2   : > { %p167_p1 = scmp.lt.s32.totalorder %s616_s15, 3 }
   0x4   : > { %p168_p2 = pnand %p523_p0, %p167_p1 }
   0x5   : > { %v591_v0 = vld [vmem:[%s724_s1 + $0x40] sm:$0xff] (!%p168_p2)   ;;  %s524_s19 = sshll.u32 (!%p168_p2), %s649_s16, 1  ;;  %v593_v2 = vld [vmem:[%s724_s1 + $0x48] sm:$0xff] (!%p168_p2)   ;;  %v595_v4 = vld [vmem:[%s724_s1 + $0x50] sm:$0xff] (!%p168_p2)   ;;  %p211_p4 = scmp.lt.s32.totalorder (!%p168_p2), %s649_s16, 1 }
   0x6   : > { %171 = sbr.rel (%p168_p2) target bundleno = 274 (0x112), region = 32  ;;  %v592_v1 = vld [vmem:[%s724_s1] sm:$0xff] (!%p168_p2)   ;;  %561 = vmatprep.subr.bf16.mxu0 (!%p168_p2), %v591_v0  ;;  %v594_v3 = vld [vmem:[%s724_s1 + $0x8] sm:$0xff] (!%p168_p2)   ;;  %p199_p3 = scmp.lt.s32.totalorder (!%p168_p2), %s524_s19, 3  ;;  %v596_v5 = vld [vmem:[%s724_s1 + $0x10] sm:$0xff] (!%p168_p2)  }
   0x7   : > { %562 = vmatpush3.bf16.msra.mxu0 (!%p168_p2), %v592_v1  ;;  %v597_v6 = vld [vmem:[%s724_s1 + $0x58] sm:$0xff] (!%p168_p2)   ;;  %v599_v8 = vld [vmem:[%s724_s1 + $0x60] sm:$0xff] (!%p168_p2)   ;;  %v601_v10 = vld [vmem:[%s724_s1 + $0x68] sm:$0xff] (!%p168_p2)  }
   0x8   : > { %563 = vmatprep.subr.bf16.mxu0 (!%p168_p2), %v593_v2  ;;  %v598_v7 = vld [vmem:[%s724_s1 + $0x18] sm:$0xff] (!%p168_p2)   ;;  %v600_v9 = vld [vmem:[%s724_s1 + $0x20] sm:$0xff] (!%p168_p2)   ;;  %v602_v12 = vld [vmem:[%s724_s1 + $0x28] sm:$0xff] (!%p168_p2)  }
   0x9   : > { %v603_v13 = vld [vmem:[%s724_s1 + $0x70] sm:$0xff] (!%p168_p2)   ;;  %v605_v15 = vld [vmem:[%s724_s1 + $0x78] sm:$0xff] (!%p168_p2)   ;;  %v530_v19 = vld [vmem:[%s725_s2] ss:$0 sm:$0xff] (!%p168_p2) }
   0xa   : > { %v604_v14 = vld [vmem:[%s724_s1 + $0x30] sm:$0xff] (!%p168_p2)   ;;  %v606_v16 = vld [vmem:[%s724_s1 + $0x38] sm:$0xff] (!%p168_p2)  }
   0xb   : > { %564 = vmatpush3.bf16.msra.mxu0 (!%p168_p2), %v594_v3 }
   0xc   : > { %565 = vmatprep.subr.bf16.mxu0 (!%p168_p2), %v595_v4 }
   0xd   : > { %s729_s19 = smov (!%p199_p3, %s524_s19), 3  ;;  %s731_s16 = smov (!%p211_p4, %s649_s16), 1 }
   0xe   : > { %s553_s8 = sshll.u32 %s729_s19, 3  ;;  %s528_s7 = sshll.u32 %s729_s19, 2 }
   0xf   : > { %566 = vmatpush3.bf16.msra.mxu0 %v596_v5  ;;  %s203_s13 = scalar_lea.vmem %s723_s0, %s553_s8  ;;  %s209_s10 = scalar_lea.vmem %s726_s3, %s528_s7 }
  0x10   : > { %567 = vmatprep.subr.bf16.mxu0 %v597_v6  ;;  %v609_v11 = vld [vmem:[%s203_s13 + $0x4] ss:$8 sps:$4 sm:$0xff]   ;;  %v607_v17 = vld [vmem:[%s203_s13] ss:$8 sps:$4 sm:$0xff]   ;;  %s529_s19 = sshll.u32 %s731_s16, 3 }
  0x11   : > { %395 = vmatprep.mubr.bf16.mxu0 %v609_v11  ;;  %s214_s13 = scalar_lea.vmem %s727_s4, %s529_s19 }
  0x13   : > { %568 = vmatpush3.bf16.msra.mxu0 %v598_v7 }
  0x14   : > { %569 = vmatprep.subr.bf16.mxu0 %v599_v8 }
  0x17   : > { %570 = vmatpush3.bf16.msra.mxu0 %v600_v9 }
  0x18   : > { %571 = vmatprep.subr.bf16.mxu0 %v601_v10 }
  0x1b   : > { %572 = vmatpush3.bf16.msra.mxu0 %v602_v12 }
  0x1c   : > { %573 = vmatprep.subr.bf16.mxu0 %v603_v13 }
  0x1f   : > { %574 = vmatpush3.bf16.msra.mxu0 %v604_v14 }
  0x20   : > { %575 = vmatprep.subr.bf16.mxu0 %v605_v15 }
  0x23   : > { %576 = vmatpush3.bf16.msra.mxu0 %v606_v16 }
  0x26   : > { %396 = vmatmul.mubr.bf16.vlgmr.msra.gmra.mrb[0].mxu0 %v607_v17 }
  0xf9   : > { %v577_v18 = vpop.f32.mrb[0].mxu0 }
  0xfa   : > { %v578_v20 = vpop.f32.mrb[1].mxu0 }
  0xfb   : > { %v579_v21 = vadd.f32 %v578_v20, %v577_v18  ;;  %v580_v22 = vpop.f32.mrb[2].mxu0 }
  0xfc   : > { %v581_v23 = vpop.f32.mrb[3].mxu0 }
  0xfd   : > { %v398_v24 = vadd.f32 %v579_v21, %v530_v19  ;;  %v582_v25 = vadd.f32 %v581_v23, %v580_v22 }
  0xff   : > { %v401_v26 = vadd.f32 %v582_v25, %v530_v19  ;;  %v422_v27 = vmul.f32 %v398_v24, %v398_v24 }
 0x101   : > { %v559_v28 = vpack.c.bf16 %v401_v26, %v398_v24  ;;  %v414_v29 = vadd.f32 %v401_v26, %v398_v24  ;;  %v423_v30 = vmul.f32 %v401_v26, %v401_v26 }
 0x103   : > { %560 = vst [vmem:[%s209_s10] sm:$0xff] %v559_v28   ;;  %v415_v31 = vrot.slane %v414_v29, 4  ;;  %v424_v32 = vadd.f32 %v423_v30, %v422_v27 }
 0x105   : > { %v416_v33 = vadd.f32 %v415_v31, %v414_v29  ;;  %v425_v34 = vrot.slane %v424_v32, 4 }
 0x107   : > { %v417_v35 = vrot.slane %v416_v33, 2  ;;  %v426_v36 = vadd.f32 %v425_v34, %v424_v32 }
 0x109   : > { %v418_v37 = vadd.f32 %v417_v35, %v416_v33  ;;  %v427_v38 = vrot.slane %v426_v36, 2 }
 0x10b   : > { %v419_v39 = vrot.slane %v418_v37, 1  ;;  %v428_v40 = vadd.f32 %v427_v38, %v426_v36 }
 0x10d   : > { %v420_v41 = vadd.f32 %v419_v39, %v418_v37  ;;  %v429_v42 = vrot.slane %v428_v40, 1 }
 0x10f   : > { %421 = vst [vmem:[%s214_s13] sm:$0x1] %v420_v41  ;;  %v430_v43 = vadd.f32 %v429_v42, %v428_v40 }
 0x111   : > { %431 = vst [vmem:[%s214_s13 + $0x1] sm:$0x1] %v430_v43 }
 0x112 PF: > { %s15_s15 = sadd.s32 1, %s616_s15  }
 0x113   : > { %p12_p5 = scmp.ge.s32.totalorder %s15_s15, 4  }
 0x115   :  { %14 = sbr.rel (!%p12_p5) target bundleno = 1 (0x1), region = 74 }

// kernel: discriminator_forward.8
= control target key start
LH: loop header
LB: loop body
LE: loop exit
PB: predicated region body
PF: predicated region fallthrough
CT: control target
= control target key end

     0   :  { %s883_s15 = smov 0   ;;  %s1011_s0 = inlined_call_operand.vmem [shape: bf16[32,512], index: 0, kind: input, shape index: {}]   ;;  %s1012_s1 = inlined_call_operand.vmem [shape: bf16[512,128], index: 1, kind: input, shape index: {}]   ;;  %s1013_s2 = inlined_call_operand.vmem [shape: f32[1,128], index: 2, kind: input, shape index: {}]   ;;  %s1014_s3 = inlined_call_operand.vmem [shape: bf16[32,128], index: 3, kind: output, shape index: {0}]   ;;  %s1015_s4 = inlined_call_operand.vmem [shape: f32[16,128], index: 4, kind: output, shape index: {1}]  }
   0x1 LB: > { %s889_s16 = sadd.s32 4294967295, %s856_s15   ;;  %p704_p0 = scmp.ge.s32.totalorder %s856_s15, 1  ;;  %s856_s15 = sphi %s883_s15, %s15_s15  }
   0x2   : > { %p167_p1 = scmp.lt.s32.totalorder %s856_s15, 3 }
   0x4   : > { %p168_p2 = pnand %p704_p0, %p167_p1 }
   0x5   : > { %v812_v0 = vld [vmem:[%s1012_s1 + $0x40] sm:$0xff] (!%p168_p2)   ;;  %v816_v4 = vld [vmem:[%s1012_s1 + $0x48] sm:$0xff] (!%p168_p2)   ;;  %v820_v8 = vld [vmem:[%s1012_s1 + $0x50] sm:$0xff] (!%p168_p2)   ;;  %s705_s25 = sshll.u32 (!%p168_p2), %s889_s16, 1  ;;  %p211_p4 = scmp.lt.s32.totalorder (!%p168_p2), %s889_s16, 1 }
   0x6   : > { %171 = sbr.rel (%p168_p2) target bundleno = 277 (0x115), region = 32  ;;  %v813_v1 = vld [vmem:[%s1012_s1 + $0xc0] sm:$0xff] (!%p168_p2)   ;;  %760 = vmatprep.subr.bf16.mxu0 (!%p168_p2), %v812_v0  ;;  %v817_v5 = vld [vmem:[%s1012_s1 + $0xc8] sm:$0xff] (!%p168_p2)   ;;  %v821_v9 = vld [vmem:[%s1012_s1 + $0xd0] sm:$0xff] (!%p168_p2)   ;;  %p199_p3 = scmp.lt.s32.totalorder (!%p168_p2), %s705_s25, 3 }
   0x7   : > { %v814_v2 = vld [vmem:[%s1012_s1] sm:$0xff] (!%p168_p2)   ;;  %782 = vmatprep.subr.bf16.mxu1 (!%p168_p2), %v813_v1  ;;  %v818_v6 = vld [vmem:[%s1012_s1 + $0x8] sm:$0xff] (!%p168_p2)   ;;  %v822_v10 = vld [vmem:[%s1012_s1 + $0x10] sm:$0xff] (!%p168_p2)  }
   0x8   : > { %v815_v3 = vld [vmem:[%s1012_s1 + $0x80] sm:$0xff] (!%p168_p2)   ;;  %761 = vmatpush3.bf16.msra.mxu0 (!%p168_p2), %v814_v2  ;;  %v819_v7 = vld [vmem:[%s1012_s1 + $0x88] sm:$0xff] (!%p168_p2)   ;;  %v823_v11 = vld [vmem:[%s1012_s1 + $0x90] sm:$0xff] (!%p168_p2)  }
   0x9   : > { %783 = vmatpush3.bf16.msra.mxu1 (!%p168_p2), %v815_v3  ;;  %762 = vmatprep.subr.bf16.mxu0 (!%p168_p2), %v816_v4  ;;  %v824_v12 = vld [vmem:[%s1012_s1 + $0x58] sm:$0xff] (!%p168_p2)   ;;  %v828_v16 = vld [vmem:[%s1012_s1 + $0x60] sm:$0xff] (!%p168_p2)   ;;  %v832_v20 = vld [vmem:[%s1012_s1 + $0x68] sm:$0xff] (!%p168_p2)  }
   0xa   : > { %784 = vmatprep.subr.bf16.mxu1 (!%p168_p2), %v817_v5  ;;  %v825_v13 = vld [vmem:[%s1012_s1 + $0xd8] sm:$0xff] (!%p168_p2)   ;;  %v829_v17 = vld [vmem:[%s1012_s1 + $0xe0] sm:$0xff] (!%p168_p2)   ;;  %v833_v21 = vld [vmem:[%s1012_s1 + $0xe8] sm:$0xff] (!%p168_p2)  }
   0xb   : > { %v826_v14 = vld [vmem:[%s1012_s1 + $0x18] sm:$0xff] (!%p168_p2)   ;;  %v830_v18 = vld [vmem:[%s1012_s1 + $0x20] sm:$0xff] (!%p168_p2)   ;;  %v834_v22 = vld [vmem:[%s1012_s1 + $0x28] sm:$0xff] (!%p168_p2)  }
   0xc   : > { %763 = vmatpush3.bf16.msra.mxu0 (!%p168_p2), %v818_v6  ;;  %v827_v15 = vld [vmem:[%s1012_s1 + $0x98] sm:$0xff] (!%p168_p2)   ;;  %v831_v19 = vld [vmem:[%s1012_s1 + $0xa0] sm:$0xff] (!%p168_p2)   ;;  %v835_v23 = vld [vmem:[%s1012_s1 + $0xa8] sm:$0xff] (!%p168_p2)  }
   0xd   : > { %785 = vmatpush3.bf16.msra.mxu1 %v819_v7  ;;  %764 = vmatprep.subr.bf16.mxu0 %v820_v8  ;;  %s1017_s25 = smov (!%p199_p3, %s705_s25), 3  ;;  %v836_v24 = vld [vmem:[%s1012_s1 + $0x70] sm:$0xff]   ;;  %v840_v28 = vld [vmem:[%s1012_s1 + $0x78] sm:$0xff]   ;;  %v711_v38 = vld [vmem:[%s1013_s2] ss:$0 sm:$0xff]  ;;  %s1019_s16 = smov (!%p211_p4, %s889_s16), 1 }
   0xe   : > { %786 = vmatprep.subr.bf16.mxu1 %v821_v9  ;;  %v837_v25 = vld [vmem:[%s1012_s1 + $0xf0] sm:$0xff]   ;;  %s752_s24 = sshll.u32 %s1017_s25, 4  ;;  %v841_v29 = vld [vmem:[%s1012_s1 + $0xf8] sm:$0xff]   ;;  %s709_s17 = sshll.u32 %s1017_s25, 2 }
   0xf   : > { %v838_v26 = vld [vmem:[%s1012_s1 + $0x30] sm:$0xff]   ;;  %s203_s8 = scalar_lea.vmem %s1011_s0, %s752_s24  ;;  %v842_v30 = vld [vmem:[%s1012_s1 + $0x38] sm:$0xff]   ;;  %s209_s20 = scalar_lea.vmem %s1014_s3, %s709_s17 }
  0x10   : > { %765 = vmatpush3.bf16.msra.mxu0 %v822_v10  ;;  %v839_v27 = vld [vmem:[%s1012_s1 + $0xb0] sm:$0xff]   ;;  %v843_v31 = vld [vmem:[%s1012_s1 + $0xb8] sm:$0xff]   ;;  %s710_s25 = sshll.u32 %s1019_s16, 3 }
  0x11   : > { %787 = vmatpush3.bf16.msra.mxu1 %v823_v11  ;;  %766 = vmatprep.subr.bf16.mxu0 %v824_v12  ;;  %v844_v32 = vld [vmem:[%s203_s8] ss:$16 sps:$4 sm:$0xff]   ;;  %v846_v33 = vld [vmem:[%s203_s8 + $0x4] ss:$16 sps:$4 sm:$0xff]   ;;  %v847_v34 = vld [vmem:[%s203_s8 + $0x8] ss:$16 sps:$4 sm:$0xff]   ;;  %s214_s23 = scalar_lea.vmem %s1015_s4, %s710_s25 }
  0x12   : > { %788 = vmatprep.subr.bf16.mxu1 %v825_v13  ;;  %v849_v35 = vld [vmem:[%s203_s8 + $0xc] ss:$16 sps:$4 sm:$0xff]   ;;  %535 = vmatprep.mubr.bf16.mxu0 %v846_v33 }
  0x13   : > { %576 = vmatprep.mubr.bf16.mxu1 %v849_v35 }
  0x14   : > { %767 = vmatpush3.bf16.msra.mxu0 %v826_v14 }
  0x15   : > { %789 = vmatpush3.bf16.msra.mxu1 %v827_v15  ;;  %768 = vmatprep.subr.bf16.mxu0 %v828_v16 }
  0x16   : > { %790 = vmatprep.subr.bf16.mxu1 %v829_v17 }
  0x18   : > { %769 = vmatpush3.bf16.msra.mxu0 %v830_v18 }
  0x19   : > { %791 = vmatpush3.bf16.msra.mxu1 %v831_v19  ;;  %770 = vmatprep.subr.bf16.mxu0 %v832_v20 }
  0x1a   : > { %792 = vmatprep.subr.bf16.mxu1 %v833_v21 }
  0x1c   : > { %771 = vmatpush3.bf16.msra.mxu0 %v834_v22 }
  0x1d   : > { %793 = vmatpush3.bf16.msra.mxu1 %v835_v23  ;;  %772 = vmatprep.subr.bf16.mxu0 %v836_v24 }
  0x1e   : > { %794 = vmatprep.subr.bf16.mxu1 %v837_v25 }
  0x20   : > { %773 = vmatpush3.bf16.msra.mxu0 %v838_v26 }
  0x21   : > { %795 = vmatpush3.bf16.msra.mxu1 %v839_v27  ;;  %774 = vmatprep.subr.bf16.mxu0 %v840_v28 }
  0x22   : > { %796 = vmatprep.subr.bf16.mxu1 %v841_v29 }
  0x24   : > { %775 = vmatpush3.bf16.msra.mxu0 %v842_v30 }
  0x25   : > { %797 = vmatpush3.bf16.msra.mxu1 %v843_v31 }
  0x27   : > { %536 = vmatmul.mubr.bf16.vlgmr.msra.gmra.mrb[0].mxu0 %v844_v32 }
  0x28   : > { %577 = vmatmul.mubr.bf16.vlgmr.msra.gmra.mrb[0].mxu1 %v847_v34 }
  0xfa   : > { %v776_v36 = vpop.f32.mrb[0].mxu0 }
  0xfb   : > { %v798_v37 = vpop.f32.mrb[0].mxu1  ;;  %v777_v39 = vpop.f32.mrb[1].mxu0 }
  0xfc   : > { %v778_v40 = vadd.f32 %v777_v39, %v776_v36  ;;  %v799_v41 = vpop.f32.mrb[1].mxu1  ;;  %v779_v42 = vpop.f32.mrb[2].mxu0 }
  0xfd   : > { %v800_v43 = vadd.f32 %v799_v41, %v798_v37  ;;  %v801_v44 = vpop.f32.mrb[2].mxu1  ;;  %v780_v45 = vpop.f32.mrb[3].mxu0 }
  0xfe   : > { %v538_v46 = vadd.f32 %v778_v40, %v711_v38  ;;  %v781_v47 = vadd.f32 %v780_v45, %v779_v42  ;;  %v802_v48 = vpop.f32.mrb[3].mxu1 }
  0xff   : > { %v803_v49 = vadd.f32 %v802_v48, %v801_v44 }
 0x100   : > { %v579_v50 = vadd.f32 %v800_v43, %v538_v46  ;;  %v541_v51 = vadd.f32 %v781_v47, %v711_v38 }
 0x102   : > { %v582_v52 = vadd.f32 %v803_v49, %v541_v51  ;;  %v603_v53 = vmul.f32 %v579_v50, %v579_v50 }
 0x104   : > { %v758_v54 = vpack.c.bf16 %v582_v52, %v579_v50  ;;  %v595_v55 = vadd.f32 %v582_v52, %v579_v50  ;;  %v604_v56 = vmul.f32 %v582_v52, %v582_v52 }
 0x106   : > { %759 = vst [vmem:[%s209_s20] sm:$0xff] %v758_v54   ;;  %v596_v57 = vrot.slane %v595_v55, 4  ;;  %v605_v58 = vadd.f32 %v604_v56, %v603_v53 }
 0x108   : > { %v597_v59 = vadd.f32 %v596_v57, %v595_v55  ;;  %v606_v60 = vrot.slane %v605_v58, 4 }
 0x10a   : > { %v598_v61 = vrot.slane %v597_v59, 2  ;;  %v607_v62 = vadd.f32 %v606_v60, %v605_v58 }
 0x10c   : > { %v599_v63 = vadd.f32 %v598_v61, %v597_v59  ;;  %v608_v0 = vrot.slane %v607_v62, 2 }
 0x10e   : > { %v600_v1 = vrot.slane %v599_v63, 1  ;;  %v609_v2 = vadd.f32 %v608_v0, %v607_v62 }
 0x110   : > { %v601_v3 = vadd.f32 %v600_v1, %v599_v63  ;;  %v610_v4 = vrot.slane %v609_v2, 1 }
 0x112   : > { %602 = vst [vmem:[%s214_s23] sm:$0x1] %v601_v3  ;;  %v611_v5 = vadd.f32 %v610_v4, %v609_v2 }
 0x114   : > { %612 = vst [vmem:[%s214_s23 + $0x1] sm:$0x1] %v611_v5 }
 0x115 PF: > { %s15_s15 = sadd.s32 1, %s856_s15  }
 0x116   : > { %p12_p5 = scmp.ge.s32.totalorder %s15_s15, 4  }
 0x118   :  { %14 = sbr.rel (!%p12_p5) target bundleno = 1 (0x1), region = 74 }

// kernel: discriminator_forward.9
= control target key start
LH: loop header
LB: loop body
LE: loop exit
PB: predicated region body
PF: predicated region fallthrough
CT: control target
= control target key end

     0   :  { %s1222_s1 = inlined_call_operand.vmem [shape: bf16[1024,128], index: 1, kind: input, shape index: {}]   ;;  %s1223_s0 = inlined_call_operand.vmem [shape: bf16[16,1024], index: 0, kind: input, shape index: {}]   ;;  %s1224_s2 = inlined_call_operand.vmem [shape: f32[1,128], index: 2, kind: input, shape index: {}]   ;;  %s1225_s3 = inlined_call_operand.vmem [shape: f32[16,128], index: 3, kind: output, shape index: {}]  }
   0x1   :  { %v913_v0 = vld [vmem:[%s1222_s1 + $0x40] sm:$0xff]   ;;  %v917_v4 = vld [vmem:[%s1222_s1 + $0x48] sm:$0xff]   ;;  %v921_v8 = vld [vmem:[%s1222_s1 + $0x50] sm:$0xff]  }
   0x2   :  { %v914_v1 = vld [vmem:[%s1222_s1 + $0xc0] sm:$0xff]   ;;  %825 = vmatprep.subr.bf16.mxu0 %v913_v0  ;;  %v918_v5 = vld [vmem:[%s1222_s1 + $0xc8] sm:$0xff]   ;;  %v922_v9 = vld [vmem:[%s1222_s1 + $0xd0] sm:$0xff]  }
   0x3   :  { %v915_v2 = vld [vmem:[%s1222_s1] sm:$0xff]   ;;  %847 = vmatprep.subr.bf16.mxu1 %v914_v1  ;;  %v919_v6 = vld [vmem:[%s1222_s1 + $0x8] sm:$0xff]   ;;  %v923_v10 = vld [vmem:[%s1222_s1 + $0x10] sm:$0xff]  }
   0x4   :  { %v916_v3 = vld [vmem:[%s1222_s1 + $0x80] sm:$0xff]   ;;  %826 = vmatpush3.bf16.msra.mxu0 %v915_v2  ;;  %v920_v7 = vld [vmem:[%s1222_s1 + $0x88] sm:$0xff]   ;;  %v924_v11 = vld [vmem:[%s1222_s1 + $0x90] sm:$0xff]  }
   0x5   :  { %848 = vmatpush3.bf16.msra.mxu1 %v916_v3  ;;  %827 = vmatprep.subr.bf16.mxu0 %v917_v4  ;;  %v925_v12 = vld [vmem:[%s1222_s1 + $0x58] sm:$0xff]   ;;  %v929_v16 = vld [vmem:[%s1222_s1 + $0x60] sm:$0xff]   ;;  %v933_v20 = vld [vmem:[%s1222_s1 + $0x68] sm:$0xff]  }
   0x6   :  { %849 = vmatprep.subr.bf16.mxu1 %v918_v5  ;;  %v926_v13 = vld [vmem:[%s1222_s1 + $0xd8] sm:$0xff]   ;;  %v930_v17 = vld [vmem:[%s1222_s1 + $0xe0] sm:$0xff]   ;;  %v934_v21 = vld [vmem:[%s1222_s1 + $0xe8] sm:$0xff]  }
   0x7   :  { %v927_v14 = vld [vmem:[%s1222_s1 + $0x18] sm:$0xff]   ;;  %v931_v18 = vld [vmem:[%s1222_s1 + $0x20] sm:$0xff]   ;;  %v935_v22 = vld [vmem:[%s1222_s1 + $0x28] sm:$0xff]  }
   0x8   :  { %828 = vmatpush3.bf16.msra.mxu0 %v919_v6  ;;  %v928_v15 = vld [vmem:[%s1222_s1 + $0x98] sm:$0xff]   ;;  %v932_v19 = vld [vmem:[%s1222_s1 + $0xa0] sm:$0xff]   ;;  %v936_v23 = vld [vmem:[%s1222_s1 + $0xa8] sm:$0xff]  }
   0x9   :  { %850 = vmatpush3.bf16.msra.mxu1 %v920_v7  ;;  %829 = vmatprep.subr.bf16.mxu0 %v921_v8  ;;  %v937_v24 = vld [vmem:[%s1222_s1 + $0x70] sm:$0xff]   ;;  %v941_v28 = vld [vmem:[%s1222_s1 + $0x78] sm:$0xff]   ;;  %v15_v32 = vld [vmem:[%s1223_s0] sm:$0xff] }
   0xa   :  { %851 = vmatprep.subr.bf16.mxu1 %v922_v9  ;;  %v938_v25 = vld [vmem:[%s1222_s1 + $0xf0] sm:$0xff]   ;;  %v942_v29 = vld [vmem:[%s1222_s1 + $0xf8] sm:$0xff]   ;;  %v19_v33 = vld [vmem:[%s1223_s0 + $0x20] sm:$0xff] }
   0xb   :  { %v939_v26 = vld [vmem:[%s1222_s1 + $0x30] sm:$0xff]   ;;  %v943_v30 = vld [vmem:[%s1222_s1 + $0x38] sm:$0xff]   ;;  %v16_v34 = vld [vmem:[%s1223_s0 + $0x8] sm:$0xff]  ;;  %v753_v35 = vcombine.low %v15_v32, %v19_v33  ;;  %v754_v36 = vcombine.high %v15_v32, %v19_v33 }
   0xc   :  { %830 = vmatpush3.bf16.msra.mxu0 %v923_v10  ;;  %v940_v27 = vld [vmem:[%s1222_s1 + $0xb0] sm:$0xff]   ;;  %v944_v31 = vld [vmem:[%s1222_s1 + $0xb8] sm:$0xff]   ;;  %v20_v37 = vld [vmem:[%s1223_s0 + $0x28] sm:$0xff] }
   0xd   :  { %852 = vmatpush3.bf16.msra.mxu1 %v924_v11  ;;  %831 = vmatprep.subr.bf16.mxu0 %v925_v12  ;;  %v755_v38 = vcombine.low %v16_v34, %v20_v37  ;;  %v756_v39 = vcombine.high %v16_v34, %v20_v37  ;;  %v945_v40 = vld [vmem:[%s1222_s1 + $0x140] sm:$0xff]   ;;  %v949_v44 = vld [vmem:[%s1222_s1 + $0x148] sm:$0xff]   ;;  %v953_v48 = vld [vmem:[%s1222_s1 + $0x150] sm:$0xff]  }
   0xe   :  { %853 = vmatprep.subr.bf16.mxu1 %v926_v13  ;;  %614 = vmatprep.mubr.bf16.mxu0 %v754_v36  ;;  %v946_v41 = vld [vmem:[%s1222_s1 + $0x1c0] sm:$0xff]   ;;  %v950_v45 = vld [vmem:[%s1222_s1 + $0x1c8] sm:$0xff]   ;;  %v954_v49 = vld [vmem:[%s1222_s1 + $0x1d0] sm:$0xff]  }
   0xf   :  { %655 = vmatprep.mubr.bf16.mxu1 %v756_v39  ;;  %v947_v42 = vld [vmem:[%s1222_s1 + $0x100] sm:$0xff]   ;;  %v951_v46 = vld [vmem:[%s1222_s1 + $0x108] sm:$0xff]   ;;  %v955_v50 = vld [vmem:[%s1222_s1 + $0x110] sm:$0xff]  }
  0x10   :  { %832 = vmatpush3.bf16.msra.mxu0 %v927_v14  ;;  %v948_v43 = vld [vmem:[%s1222_s1 + $0x180] sm:$0xff]   ;;  %v952_v47 = vld [vmem:[%s1222_s1 + $0x188] sm:$0xff]   ;;  %v956_v51 = vld [vmem:[%s1222_s1 + $0x190] sm:$0xff]  }
  0x11   :  { %854 = vmatpush3.bf16.msra.mxu1 %v928_v15  ;;  %833 = vmatprep.subr.bf16.mxu0 %v929_v16  ;;  %v957_v52 = vld [vmem:[%s1222_s1 + $0x158] sm:$0xff]   ;;  %v961_v56 = vld [vmem:[%s1222_s1 + $0x160] sm:$0xff]   ;;  %v965_v60 = vld [vmem:[%s1222_s1 + $0x168] sm:$0xff]  }
  0x12   :  { %855 = vmatprep.subr.bf16.mxu1 %v930_v17  ;;  %v958_v53 = vld [vmem:[%s1222_s1 + $0x1d8] sm:$0xff]   ;;  %v962_v57 = vld [vmem:[%s1222_s1 + $0x1e0] sm:$0xff]   ;;  %v966_v61 = vld [vmem:[%s1222_s1 + $0x1e8] sm:$0xff]  }
  0x13   :  { %v959_v54 = vld [vmem:[%s1222_s1 + $0x118] sm:$0xff]   ;;  %v963_v58 = vld [vmem:[%s1222_s1 + $0x120] sm:$0xff]   ;;  %v967_v62 = vld [vmem:[%s1222_s1 + $0x128] sm:$0xff]  }
  0x14   :  { %834 = vmatpush3.bf16.msra.mxu0 %v931_v18  ;;  %v960_v55 = vld [vmem:[%s1222_s1 + $0x198] sm:$0xff]   ;;  %v964_v59 = vld [vmem:[%s1222_s1 + $0x1a0] sm:$0xff]   ;;  %v968_v63 = vld [vmem:[%s1222_s1 + $0x1a8] sm:$0xff]  }
  0x15   :  { %856 = vmatpush3.bf16.msra.mxu1 %v932_v19  ;;  %835 = vmatprep.subr.bf16.mxu0 %v933_v20  ;;  %v969_v0 = vld [vmem:[%s1222_s1 + $0x170] sm:$0xff]   ;;  %v973_v4 = vld [vmem:[%s1222_s1 + $0x178] sm:$0xff]   ;;  %v752_v18 = vld [vmem:[%s1224_s2] ss:$0 sm:$0xff] }
  0x16   :  { %857 = vmatprep.subr.bf16.mxu1 %v934_v21  ;;  %v970_v1 = vld [vmem:[%s1222_s1 + $0x1f0] sm:$0xff]   ;;  %v974_v5 = vld [vmem:[%s1222_s1 + $0x1f8] sm:$0xff]  }
  0x17   :  { %v971_v2 = vld [vmem:[%s1222_s1 + $0x130] sm:$0xff]   ;;  %v975_v6 = vld [vmem:[%s1222_s1 + $0x138] sm:$0xff]  }
  0x18   :  { %836 = vmatpush3.bf16.msra.mxu0 %v935_v22  ;;  %v972_v3 = vld [vmem:[%s1222_s1 + $0x1b0] sm:$0xff]   ;;  %v976_v7 = vld [vmem:[%s1222_s1 + $0x1b8] sm:$0xff]  }
  0x19   :  { %858 = vmatpush3.bf16.msra.mxu1 %v936_v23  ;;  %837 = vmatprep.subr.bf16.mxu0 %v937_v24  ;;  %v17_v8 = vld [vmem:[%s1223_s0 + $0x10] sm:$0xff]  ;;  %v18_v12 = vld [vmem:[%s1223_s0 + $0x18] sm:$0xff] }
  0x1a   :  { %859 = vmatprep.subr.bf16.mxu1 %v938_v25  ;;  %v21_v9 = vld [vmem:[%s1223_s0 + $0x30] sm:$0xff]  ;;  %v22_v13 = vld [vmem:[%s1223_s0 + $0x38] sm:$0xff] }
  0x1b   :  { %v757_v10 = vcombine.low %v17_v8, %v21_v9  ;;  %v758_v11 = vcombine.high %v17_v8, %v21_v9  ;;  %v759_v14 = vcombine.low %v18_v12, %v22_v13  ;;  %v760_v15 = vcombine.high %v18_v12, %v22_v13 }
  0x1c   :  { %838 = vmatpush3.bf16.msra.mxu0 %v939_v26 }
  0x1d   :  { %860 = vmatpush3.bf16.msra.mxu1 %v940_v27  ;;  %839 = vmatprep.subr.bf16.mxu0 %v941_v28 }
  0x1e   :  { %861 = vmatprep.subr.bf16.mxu1 %v942_v29 }
  0x20   :  { %840 = vmatpush3.bf16.msra.mxu0 %v943_v30 }
  0x21   :  { %862 = vmatpush3.bf16.msra.mxu1 %v944_v31  ;;  %869 = vmatprep.subr.bf16.mxu0 %v945_v40 }
  0x22   :  { %891 = vmatprep.subr.bf16.mxu1 %v946_v41 }
  0x23   :  { %615 = vmatmul.mubr.bf16.vlgmr.msra.gmra.mrb[0].mxu0 %v753_v35 }
  0x24   :  { %656 = vmatmul.mubr.bf16.vlgmr.msra.gmra.mrb[0].mxu1 %v755_v38  ;;  %870 = vmatpush3.bf16.msra.mxu0 %v947_v42 }
  0x25   :  { %892 = vmatpush3.bf16.msra.mxu1 %v948_v43  ;;  %871 = vmatprep.subr.bf16.mxu0 %v949_v44 }
  0x26   :  { %893 = vmatprep.subr.bf16.mxu1 %v950_v45  ;;  %696 = vmatprep.mubr.bf16.mxu0 %v758_v11 }
  0x27   :  { %737 = vmatprep.mubr.bf16.mxu1 %v760_v15 }
  0x28   :  { %872 = vmatpush3.bf16.msra.mxu0 %v951_v46 }
  0x29   :  { %894 = vmatpush3.bf16.msra.mxu1 %v952_v47  ;;  %873 = vmatprep.subr.bf16.mxu0 %v953_v48 }
  0x2a   :  { %895 = vmatprep.subr.bf16.mxu1 %v954_v49 }
  0x2c   :  { %874 = vmatpush3.bf16.msra.mxu0 %v955_v50 }
  0x2d   :  { %896 = vmatpush3.bf16.msra.mxu1 %v956_v51  ;;  %875 = vmatprep.subr.bf16.mxu0 %v957_v52 }
  0x2e   :  { %897 = vmatprep.subr.bf16.mxu1 %v958_v53 }
  0x30   :  { %876 = vmatpush3.bf16.msra.mxu0 %v959_v54 }
  0x31   :  { %898 = vmatpush3.bf16.msra.mxu1 %v960_v55  ;;  %877 = vmatprep.subr.bf16.mxu0 %v961_v56 }
  0x32   :  { %899 = vmatprep.subr.bf16.mxu1 %v962_v57 }
  0x34   :  { %878 = vmatpush3.bf16.msra.mxu0 %v963_v58 }
  0x35   :  { %900 = vmatpush3.bf16.msra.mxu1 %v964_v59  ;;  %879 = vmatprep.subr.bf16.mxu0 %v965_v60 }
  0x36   :  { %901 = vmatprep.subr.bf16.mxu1 %v966_v61 }
  0x38   :  { %880 = vmatpush3.bf16.msra.mxu0 %v967_v62 }
  0x39   :  { %902 = vmatpush3.bf16.msra.mxu1 %v968_v63  ;;  %881 = vmatprep.subr.bf16.mxu0 %v969_v0 }
  0x3a   :  { %903 = vmatprep.subr.bf16.mxu1 %v970_v1 }
  0x3c   :  { %882 = vmatpush3.bf16.msra.mxu0 %v971_v2 }
  0x3d   :  { %904 = vmatpush3.bf16.msra.mxu1 %v972_v3  ;;  %883 = vmatprep.subr.bf16.mxu0 %v973_v4 }
  0x3e   :  { %905 = vmatprep.subr.bf16.mxu1 %v974_v5 }
  0x40   :  { %884 = vmatpush3.bf16.msra.mxu0 %v975_v6 }
  0x41   :  { %906 = vmatpush3.bf16.msra.mxu1 %v976_v7 }
  0x43   :  { %697 = vmatmul.mubr.bf16.vlgmr.msra.gmra.mrb[4].mxu0 %v757_v10 }
  0x44   :  { %738 = vmatmul.mubr.bf16.vlgmr.msra.gmra.mrb[4].mxu1 %v759_v14 }
  0xf6   :  { %v841_v16 = vpop.f32.mrb[0].mxu0 }
  0xf7   :  { %v863_v17 = vpop.f32.mrb[0].mxu1  ;;  %v842_v19 = vpop.f32.mrb[1].mxu0 }
  0xf8   :  { %v843_v20 = vadd.f32 %v842_v19, %v841_v16  ;;  %v864_v21 = vpop.f32.mrb[1].mxu1  ;;  %v844_v22 = vpop.f32.mrb[2].mxu0 }
  0xf9   :  { %v865_v23 = vadd.f32 %v864_v21, %v863_v17  ;;  %v866_v24 = vpop.f32.mrb[2].mxu1  ;;  %v845_v25 = vpop.f32.mrb[3].mxu0 }
  0xfa   :  { %v617_v26 = vadd.f32 %v843_v20, %v752_v18  ;;  %v846_v27 = vadd.f32 %v845_v25, %v844_v22  ;;  %v867_v28 = vpop.f32.mrb[3].mxu1 }
  0xfb   :  { %v868_v29 = vadd.f32 %v867_v28, %v866_v24 }
  0xfc   :  { %v658_v30 = vadd.f32 %v865_v23, %v617_v26  ;;  %v620_v31 = vadd.f32 %v846_v27, %v752_v18 }
  0xfe   :  { %v661_v32 = vadd.f32 %v868_v29, %v620_v31 }
 0x116   :  { %v885_v33 = vpop.f32.mrb[4].mxu0 }
 0x117   :  { %v907_v34 = vpop.f32.mrb[4].mxu1  ;;  %v886_v35 = vpop.f32.mrb[5].mxu0 }
 0x118   :  { %v887_v36 = vadd.f32 %v886_v35, %v885_v33  ;;  %v908_v37 = vpop.f32.mrb[5].mxu1  ;;  %v888_v38 = vpop.f32.mrb[6].mxu0 }
 0x119   :  { %v909_v39 = vadd.f32 %v908_v37, %v907_v34  ;;  %v910_v40 = vpop.f32.mrb[6].mxu1  ;;  %v889_v41 = vpop.f32.mrb[7].mxu0 }
 0x11a   :  { %v699_v42 = vadd.f32 %v887_v36, %v658_v30  ;;  %v890_v43 = vadd.f32 %v889_v41, %v888_v38  ;;  %v911_v44 = vpop.f32.mrb[7].mxu1 }
 0x11b   :  { %v912_v45 = vadd.f32 %v911_v44, %v910_v40 }
 0x11c   :  { %v740_v46 = vadd.f32 %v909_v39, %v699_v42  ;;  %v702_v47 = vadd.f32 %v890_v43, %v661_v32 }
 0x11e   :  { %746 = vst [vmem:[%s1225_s3] sm:$0xff] %v740_v46  ;;  %v743_v48 = vadd.f32 %v912_v45, %v702_v47 }
 0x120   :  { %747 = vst [vmem:[%s1225_s3 + $0x8] sm:$0xff] %v743_v48 }

</bundles_post_ra>
